<compile_context>
chip_gen: v6e
topology: v6e:2x2x1
jax: 0.10.0
libtpu: 0.0.40
codegen_flags: <defaults>
</compile_context>

<pallas_src>
import functools
import math

import numpy as np
import jax
import jax.numpy as jnp
from jax.experimental import pallas as pl
from jax.experimental.pallas import tpu as pltpu

# ---- model hyper-parameters (small, consistent with the module's __init__) ----
NUM_CLASSES = 10
D_MODEL = 32
NUM_HEADS = 4
NUM_LAYERS = 2
D_FF = 64
MAX_SEQ_LEN = 16
BATCH = 2
SEQ = 8
LN_EPS = 1e-5

BS = BATCH * SEQ                  # 16 tokens across both batches
HB = NUM_HEADS * BS               # 64 fused-head score columns
D_K = D_MODEL // NUM_HEADS
SLAB_LANES = 128


# ----------------------------- slab layout --------------------------------------

def _build_layout():
    """Row offsets (8-aligned) for every tensor inside the single (R, 128) slab."""
    layout = {}
    row = 0

    def add(name, rows, cols):
        nonlocal row
        layout[name] = (row, rows, cols)
        row += ((rows + 7) // 8) * 8          # keep every tensor sublane-aligned

    add("pe", BS, D_MODEL)                    # pe tiled over batch -> (16, 32)
    add("attn_bias", BS, HB)                  # 0 / -1e30 cross-batch mask, (16, 64)
    add("head_mask", HB, D_MODEL)             # block-diag head selector, (64, 32)
    add("blockones", HB, HB)                  # per-head softmax-sum matrix, (64, 64)
    add("pool", BATCH, BS)                    # mean-over-seq pooling matrix, (2, 16)
    for l in range(NUM_LAYERS):
        add(f"wqkv{l}", D_MODEL, 3 * D_MODEL)
        add(f"bqkv{l}", 1, 3 * D_MODEL)
        add(f"wo{l}", D_MODEL, D_MODEL)
        add(f"bo{l}", 1, D_MODEL)
        add(f"g1{l}", 1, D_MODEL)
        add(f"beta1{l}", 1, D_MODEL)
        add(f"w1{l}", D_MODEL, D_FF)
        add(f"b1{l}", 1, D_FF)
        add(f"w2{l}", D_FF, D_MODEL)
        add(f"b2{l}", 1, D_MODEL)
        add(f"g2{l}", 1, D_MODEL)
        add(f"beta2{l}", 1, D_MODEL)
    add("fc1_w", D_MODEL, 128)
    add("fc1_b", 1, 128)
    add("fc2_w", 128, NUM_CLASSES)
    add("fc2_b", 1, NUM_CLASSES)
    return layout, row


SLAB_LAYOUT, SLAB_ROWS = _build_layout()


# ----------------------------- fused kernel -------------------------------------

def transformer_kernel(x_ref, slab_ref, o_ref, *, layout, num_layers):
    D = D_MODEL

    def get(name):
        r0, rows, cols = layout[name]
        return slab_ref[r0:r0 + rows, 0:cols]          # static carve, lane offset 0

    def layer_norm(y, g, b):
        mu = jnp.mean(y, axis=-1, keepdims=True)
        var = jnp.mean((y - mu) ** 2, axis=-1, keepdims=True)
        return (y - mu) * jax.lax.rsqrt(var + LN_EPS) * g + b

    # x = dropout(x + PositionalEncoding(x)) == 2*x + pe (PositionalEncoding already
    # returns x + pe; dropout == identity).  x arrives pre-flattened as (BS, D).
    x = 2.0 * x_ref[...] + get("pe")                    # (16, 32)

    attn_bias = get("attn_bias")                        # (16, 64)
    head_mask = get("head_mask")                        # (64, 32)
    blockones = get("blockones")                        # (64, 64)

    nt_dims = (((1,), (1,)), ((), ()))                  # contract last dims: A @ B^T

    for l in range(num_layers):                         # static unroll (2 layers)
        # Fused QKV projection; 1/sqrt(d_k) is folded into W_q/b_q at pack time.
        qkv = (jnp.dot(x, get(f"wqkv{l}"), preferred_element_type=jnp.float32)
               + get(f"bqkv{l}"))                       # (16, 96)
        q = qkv[:, :D]
        k = qkv[:, D:2 * D]
        v = qkv[:, 2 * D:3 * D]

        # All-heads-fused block-diagonal attention: replicate K/V along sublanes and
        # zero the cross-head lanes so one NT matmul gives every head's scores.
        k4 = jnp.concatenate([k] * NUM_HEADS, axis=0) * head_mask   # (64, 32)
        v4 = jnp.concatenate([v] * NUM_HEADS, axis=0) * head_mask   # (64, 32)

        s = jax.lax.dot_general(q, k4, nt_dims,
                                preferred_element_type=jnp.float32)  # (16, 64)
        s = s + attn_bias                                # mask cross-batch keys
        s = s - jnp.max(s, axis=-1, keepdims=True)       # shared row max (stable)
        p = jnp.exp(s)
        # Per-head denominators via one MXU matmul against a constant block matrix.
        denom = jnp.dot(p, blockones, preferred_element_type=jnp.float32)
        p = p * pl.reciprocal(denom, approx=True)
        ctx = jnp.dot(p, v4, preferred_element_type=jnp.float32)     # (16, 32) heads recombined

        attn = (jnp.dot(ctx, get(f"wo{l}"), preferred_element_type=jnp.float32)
                + get(f"bo{l}"))
        h1 = layer_norm(x + attn, get(f"g1{l}"), get(f"beta1{l}"))
        f = jnp.maximum(
            jnp.dot(h1, get(f"w1{l}"), preferred_element_type=jnp.float32)
            + get(f"b1{l}"), 0.0)
        f = jnp.dot(f, get(f"w2{l}"), preferred_element_type=jnp.float32) + get(f"b2{l}")
        x = layer_norm(h1 + f, get(f"g2{l}"), get(f"beta2{l}"))

    # classifier head: mean over sequence as a constant pooling matmul, relu, fc1, relu, fc2
    xm = jnp.dot(get("pool"), x, preferred_element_type=jnp.float32)       # (B, D)
    h = jnp.maximum(xm, 0.0)
    h = jnp.maximum(
        jnp.dot(h, get("fc1_w"), preferred_element_type=jnp.float32) + get("fc1_b"), 0.0)
    o_ref[...] = (jnp.dot(h, get("fc2_w"), preferred_element_type=jnp.float32)
                  + get("fc2_b"))


# ----------------------------- wrapper -------------------------------------------

def transformer_forward(x, slab):
    B, S, D = x.shape
    x_flat = x.reshape(B * S, D)          # free row-major reshape in HBM layout
    kern = functools.partial(transformer_kernel, layout=SLAB_LAYOUT,
                             num_layers=NUM_LAYERS)
    vmem = pltpu.MemorySpace.VMEM
    return pl.pallas_call(
        kern,
        out_shape=jax.ShapeDtypeStruct((B, NUM_CLASSES), jnp.float32),
        in_specs=[pl.BlockSpec(memory_space=vmem), pl.BlockSpec(memory_space=vmem)],
        out_specs=pl.BlockSpec(memory_space=vmem),
        compiler_params=pltpu.CompilerParams(vmem_limit_bytes=16 * 1024 * 1024),
    )(x_flat, slab)


# ----------------------------- params / packing ----------------------------------

def init_linear(key, d_in, d_out):
    kw, kb = jax.random.split(key)
    bound = 1.0 / math.sqrt(d_in)
    w = jax.random.uniform(kw, (d_in, d_out), jnp.float32, -bound, bound)
    b = jax.random.uniform(kb, (1, d_out), jnp.float32, -bound, bound)
    return w, b


def init_params(key):
    params = {"layers": []}
    for _ in range(NUM_LAYERS):
        key, *ks = jax.random.split(key, 7)
        lp = {}
        lp["wq"], lp["bq"] = init_linear(ks[0], D_MODEL, D_MODEL)
        lp["wk"], lp["bk"] = init_linear(ks[1], D_MODEL, D_MODEL)
        lp["wv"], lp["bv"] = init_linear(ks[2], D_MODEL, D_MODEL)
        lp["wo"], lp["bo"] = init_linear(ks[3], D_MODEL, D_MODEL)
        lp["w1"], lp["b1"] = init_linear(ks[4], D_MODEL, D_FF)
        lp["w2"], lp["b2"] = init_linear(ks[5], D_FF, D_MODEL)
        lp["g1"] = jnp.ones((1, D_MODEL), jnp.float32)
        lp["beta1"] = jnp.zeros((1, D_MODEL), jnp.float32)
        lp["g2"] = jnp.ones((1, D_MODEL), jnp.float32)
        lp["beta2"] = jnp.zeros((1, D_MODEL), jnp.float32)
        params["layers"].append(lp)
    key, k1, k2 = jax.random.split(key, 3)
    params["fc1_w"], params["fc1_b"] = init_linear(k1, D_MODEL, 128)
    params["fc2_w"], params["fc2_b"] = init_linear(k2, 128, NUM_CLASSES)
    return params


def make_pos_encoding(d_model, max_len):
    position = jnp.arange(max_len, dtype=jnp.float32)[:, None]
    div_term = jnp.exp(-(jnp.arange(0, d_model, 2, dtype=jnp.float32) / d_model)
                       * math.log(10000.0))
    pe = jnp.zeros((max_len, d_model), jnp.float32)
    pe = pe.at[:, 0::2].set(jnp.sin(position * div_term))
    pe = pe.at[:, 1::2].set(jnp.cos(position * div_term))
    return pe[None]                                         # (1, max_len, d_model)


def pack_params(params, pe):
    """Pack everything (weights, biases, LN params, pe, masks, pooling) into one
    (SLAB_ROWS, 128) f32 slab; fuse QKV and fold 1/sqrt(d_k) into W_q/b_q."""
    scale = 1.0 / math.sqrt(D_K)
    slab = np.zeros((SLAB_ROWS, SLAB_LANES), np.float32)

    def put(name, arr):
        arr = np.asarray(arr, np.float32)
        r0, rows, cols = SLAB_LAYOUT[name]
        assert arr.shape == (rows, cols), (name, arr.shape, (rows, cols))
        slab[r0:r0 + rows, :cols] = arr

    # positional encoding tiled over batch -> matches (BS, D) flattened activations
    put("pe", np.tile(np.asarray(pe)[0, :SEQ, :], (BATCH, 1)))

    # additive cross-batch mask for the fused (16, 64) score tile
    i = np.arange(BS)[:, None]
    m = np.arange(HB)[None, :]
    put("attn_bias", np.where((i // SEQ) == ((m % BS) // SEQ), 0.0, -1e30))

    # block-diagonal head selector for replicated K / V
    mm = np.arange(HB)[:, None]
    cc = np.arange(D_MODEL)[None, :]
    put("head_mask", ((mm // BS) == (cc // D_K)).astype(np.float32))

    # per-head softmax-denominator summation matrix
    mb = np.arange(HB)
    put("blockones", ((mb[:, None] // BS) == (mb[None, :] // BS)).astype(np.float32))

    # mean-over-sequence pooling matrix
    pool = np.zeros((BATCH, BS), np.float32)
    for b in range(BATCH):
        pool[b, b * SEQ:(b + 1) * SEQ] = 1.0 / SEQ
    put("pool", pool)

    for l, lp in enumerate(params["layers"]):
        put(f"wqkv{l}", np.concatenate(
            [np.asarray(lp["wq"]) * scale, np.asarray(lp["wk"]), np.asarray(lp["wv"])],
            axis=1))
        put(f"bqkv{l}", np.concatenate(
            [np.asarray(lp["bq"]) * scale, np.asarray(lp["bk"]), np.asarray(lp["bv"])],
            axis=1))
        put(f"wo{l}", lp["wo"])
        put(f"bo{l}", lp["bo"])
        put(f"g1{l}", lp["g1"])
        put(f"beta1{l}", lp["beta1"])
        put(f"w1{l}", lp["w1"])
        put(f"b1{l}", lp["b1"])
        put(f"w2{l}", lp["w2"])
        put(f"b2{l}", lp["b2"])
        put(f"g2{l}", lp["g2"])
        put(f"beta2{l}", lp["beta2"])
    put("fc1_w", params["fc1_w"])
    put("fc1_b", params["fc1_b"])
    put("fc2_w", params["fc2_w"])
    put("fc2_b", params["fc2_b"])
    return jnp.asarray(slab)


# ----------------------------- pure-JAX reference --------------------------------

def reference_forward(x, params, pe):
    """Pure-JAX mirror of the PyTorch forward (dropout = identity)."""
    x = 2.0 * x + pe[:, : x.shape[1], :]
    B, S, D = x.shape
    dk = D // NUM_HEADS

    def ln(y, g, b):
        mu = jnp.mean(y, -1, keepdims=True)
        var = jnp.mean((y - mu) ** 2, -1, keepdims=True)
        return (y - mu) / jnp.sqrt(var + LN_EPS) * g + b

    for lp in params["layers"]:
        q = (x @ lp["wq"] + lp["bq"]).reshape(B, S, NUM_HEADS, dk).transpose(0, 2, 1, 3)
        k = (x @ lp["wk"] + lp["bk"]).reshape(B, S, NUM_HEADS, dk).transpose(0, 2, 1, 3)
        v = (x @ lp["wv"] + lp["bv"]).reshape(B, S, NUM_HEADS, dk).transpose(0, 2, 1, 3)
        s = jnp.einsum("bhqd,bhkd->bhqk", q, k) / math.sqrt(dk)
        p = jax.nn.softmax(s, axis=-1)
        o = jnp.einsum("bhqk,bhkd->bhqd", p, v).transpose(0, 2, 1, 3).reshape(B, S, D)
        attn = o @ lp["wo"] + lp["bo"]
        h1 = ln(x + attn, lp["g1"], lp["beta1"])
        f = jnp.maximum(h1 @ lp["w1"] + lp["b1"], 0.0) @ lp["w2"] + lp["b2"]
        x = ln(h1 + f, lp["g2"], lp["beta2"])
    xm = jnp.mean(x, axis=1)
    h = jnp.maximum(xm, 0.0)
    h = jnp.maximum(h @ params["fc1_w"] + params["fc1_b"], 0.0)
    return h @ params["fc2_w"] + params["fc2_b"]


# ----------------------------- main -----------------------------------------------

if __name__ == "__main__":
    key = jax.random.PRNGKey(0)
    kx, kp = jax.random.split(key)
    params = init_params(kp)
    pe = make_pos_encoding(D_MODEL, MAX_SEQ_LEN)
    slab = pack_params(params, pe)
    x = jax.random.normal(kx, (BATCH, SEQ, D_MODEL), jnp.float32)

    out = jax.block_until_ready(transformer_forward(x, slab))

    ref = reference_forward(x, params, pe)
    assert out.shape == (BATCH, NUM_CLASSES), out.shape
    assert jnp.allclose(out, ref, atol=1e-3, rtol=1e-3), (out, ref)
    print("KERNEL_OK")
</pallas_src>

<mosaic_0001>
module attributes {stable_mosaic.version = 11 : i64} {
  func.func @transformer_kernel(%arg0: memref<16x32xf32, #tpu.memory_space<vmem>>, %arg1: memref<792x128xf32, #tpu.memory_space<vmem>>, %arg2: memref<2x10xf32, #tpu.memory_space<vmem>>) attributes {dimension_semantics = [], scalar_prefetch = 0 : i64, scratch_operands = 0 : i64, tpu.core_type = #tpu.core_type<tc>} {
    %c0 = arith.constant 0 : index
    %c0_0 = arith.constant 0 : index
    %0 = vector.load %arg0[%c0, %c0_0] : memref<16x32xf32, #tpu.memory_space<vmem>>, vector<16x32xf32>
    %cst = arith.constant 2.000000e+00 : f32
    %1 = vector.broadcast %cst : f32 to vector<16x32xf32>
    %2 = arith.mulf %1, %0 : vector<16x32xf32>
    %c0_1 = arith.constant 0 : index
    %c0_2 = arith.constant 0 : index
    %3 = vector.load %arg1[%c0_1, %c0_2] : memref<792x128xf32, #tpu.memory_space<vmem>>, vector<16x32xf32>
    %4 = arith.addf %2, %3 : vector<16x32xf32>
    %c16 = arith.constant 16 : index
    %c0_3 = arith.constant 0 : index
    %5 = vector.load %arg1[%c16, %c0_3] : memref<792x128xf32, #tpu.memory_space<vmem>>, vector<16x64xf32>
    %c32 = arith.constant 32 : index
    %c0_4 = arith.constant 0 : index
    %6 = vector.load %arg1[%c32, %c0_4] : memref<792x128xf32, #tpu.memory_space<vmem>>, vector<64x32xf32>
    %c96 = arith.constant 96 : index
    %c0_5 = arith.constant 0 : index
    %7 = vector.load %arg1[%c96, %c0_5] : memref<792x128xf32, #tpu.memory_space<vmem>>, vector<64x64xf32>
    %c168 = arith.constant 168 : index
    %c0_6 = arith.constant 0 : index
    %8 = vector.load %arg1[%c168, %c0_6] : memref<792x128xf32, #tpu.memory_space<vmem>>, vector<32x96xf32>
    %cst_7 = arith.constant dense<0.000000e+00> : vector<16x96xf32>
    %9 = tpu.matmul %4, %8, %cst_7 {dimension_numbers = #tpu.dot_dimension_numbers<[1], [0], [0], [1], [0, 0, 1, 1], [], []>} : vector<16x32xf32>, vector<32x96xf32>, vector<16x96xf32> -> vector<16x96xf32>
    %c200 = arith.constant 200 : index
    %c0_8 = arith.constant 0 : index
    %10 = vector.load %arg1[%c200, %c0_8] : memref<792x128xf32, #tpu.memory_space<vmem>>, vector<1x96xf32>
    %11 = vector.broadcast %10 : vector<1x96xf32> to vector<16x96xf32>
    %12 = arith.addf %9, %11 : vector<16x96xf32>
    %13 = vector.extract_strided_slice %12 {offsets = [0, 0], sizes = [16, 32], strides = [1, 1]} : vector<16x96xf32> to vector<16x32xf32>
    %14 = vector.extract_strided_slice %12 {offsets = [0, 32], sizes = [16, 32], strides = [1, 1]} : vector<16x96xf32> to vector<16x32xf32>
    %15 = vector.extract_strided_slice %12 {offsets = [0, 64], sizes = [16, 32], strides = [1, 1]} : vector<16x96xf32> to vector<16x32xf32>
    %16 = tpu.concatenate %14, %14, %14, %14 in 0 : vector<16x32xf32>, vector<16x32xf32>, vector<16x32xf32>, vector<16x32xf32> -> vector<64x32xf32>
    %17 = arith.mulf %16, %6 : vector<64x32xf32>
    %18 = tpu.concatenate %15, %15, %15, %15 in 0 : vector<16x32xf32>, vector<16x32xf32>, vector<16x32xf32>, vector<16x32xf32> -> vector<64x32xf32>
    %19 = arith.mulf %18, %6 : vector<64x32xf32>
    %cst_9 = arith.constant dense<0.000000e+00> : vector<16x64xf32>
    %20 = tpu.matmul %13, %17, %cst_9 {dimension_numbers = #tpu.dot_dimension_numbers<[1], [1], [0], [0], [0, 0, 1, 0], [], []>} : vector<16x32xf32>, vector<64x32xf32>, vector<16x64xf32> -> vector<16x64xf32>
    %21 = arith.addf %20, %5 : vector<16x64xf32>
    %cst_10 = arith.constant dense<0xFF800000> : vector<16xf32>
    %22 = vector.multi_reduction <maximumf>, %21, %cst_10 [1] : vector<16x64xf32> to vector<16xf32>
    %23 = vector.shape_cast %22 : vector<16xf32> to vector<16x1xf32>
    %24 = vector.broadcast %23 : vector<16x1xf32> to vector<16x64xf32>
    %25 = arith.subf %21, %24 : vector<16x64xf32>
    %26 = math.exp %25 : vector<16x64xf32>
    %cst_11 = arith.constant dense<0.000000e+00> : vector<16x64xf32>
    %27 = tpu.matmul %26, %7, %cst_11 {dimension_numbers = #tpu.dot_dimension_numbers<[1], [0], [0], [1], [0, 0, 1, 1], [], []>} : vector<16x64xf32>, vector<64x64xf32>, vector<16x64xf32> -> vector<16x64xf32>
    %28 = tpu.reciprocal %27 {approx = true} : vector<16x64xf32> -> vector<16x64xf32>
    %29 = arith.mulf %26, %28 : vector<16x64xf32>
    %cst_12 = arith.constant dense<0.000000e+00> : vector<16x32xf32>
    %30 = tpu.matmul %29, %19, %cst_12 {dimension_numbers = #tpu.dot_dimension_numbers<[1], [0], [0], [1], [0, 0, 1, 1], [], []>} : vector<16x64xf32>, vector<64x32xf32>, vector<16x32xf32> -> vector<16x32xf32>
    %c208 = arith.constant 208 : index
    %c0_13 = arith.constant 0 : index
    %31 = vector.load %arg1[%c208, %c0_13] : memref<792x128xf32, #tpu.memory_space<vmem>>, vector<32x32xf32>
    %cst_14 = arith.constant dense<0.000000e+00> : vector<16x32xf32>
    %32 = tpu.matmul %30, %31, %cst_14 {dimension_numbers = #tpu.dot_dimension_numbers<[1], [0], [0], [1], [0, 0, 1, 1], [], []>} : vector<16x32xf32>, vector<32x32xf32>, vector<16x32xf32> -> vector<16x32xf32>
    %c240 = arith.constant 240 : index
    %c0_15 = arith.constant 0 : index
    %33 = vector.load %arg1[%c240, %c0_15] : memref<792x128xf32, #tpu.memory_space<vmem>>, vector<1x32xf32>
    %34 = vector.broadcast %33 : vector<1x32xf32> to vector<16x32xf32>
    %35 = arith.addf %32, %34 : vector<16x32xf32>
    %36 = arith.addf %4, %35 : vector<16x32xf32>
    %c248 = arith.constant 248 : index
    %c0_16 = arith.constant 0 : index
    %37 = vector.load %arg1[%c248, %c0_16] : memref<792x128xf32, #tpu.memory_space<vmem>>, vector<1x32xf32>
    %c256 = arith.constant 256 : index
    %c0_17 = arith.constant 0 : index
    %38 = vector.load %arg1[%c256, %c0_17] : memref<792x128xf32, #tpu.memory_space<vmem>>, vector<1x32xf32>
    %cst_18 = arith.constant dense<0.000000e+00> : vector<16xf32>
    %39 = vector.multi_reduction <add>, %36, %cst_18 [1] : vector<16x32xf32> to vector<16xf32>
    %40 = vector.shape_cast %39 : vector<16xf32> to vector<16x1xf32>
    %cst_19 = arith.constant 3.200000e+01 : f32
    %41 = vector.broadcast %cst_19 : f32 to vector<16x1xf32>
    %42 = arith.divf %40, %41 : vector<16x1xf32>
    %43 = vector.broadcast %42 : vector<16x1xf32> to vector<16x32xf32>
    %44 = arith.subf %36, %43 : vector<16x32xf32>
    %45 = arith.mulf %44, %44 : vector<16x32xf32>
    %cst_20 = arith.constant dense<0.000000e+00> : vector<16xf32>
    %46 = vector.multi_reduction <add>, %45, %cst_20 [1] : vector<16x32xf32> to vector<16xf32>
    %47 = vector.shape_cast %46 : vector<16xf32> to vector<16x1xf32>
    %cst_21 = arith.constant 3.200000e+01 : f32
    %48 = vector.broadcast %cst_21 : f32 to vector<16x1xf32>
    %49 = arith.divf %47, %48 : vector<16x1xf32>
    %50 = vector.broadcast %42 : vector<16x1xf32> to vector<16x32xf32>
    %51 = arith.subf %36, %50 : vector<16x32xf32>
    %cst_22 = arith.constant 9.99999974E-6 : f32
    %52 = vector.broadcast %cst_22 : f32 to vector<16x1xf32>
    %53 = arith.addf %49, %52 : vector<16x1xf32>
    %54 = math.rsqrt %53 : vector<16x1xf32>
    %55 = vector.broadcast %54 : vector<16x1xf32> to vector<16x32xf32>
    %56 = arith.mulf %51, %55 : vector<16x32xf32>
    %57 = vector.broadcast %37 : vector<1x32xf32> to vector<16x32xf32>
    %58 = arith.mulf %56, %57 : vector<16x32xf32>
    %59 = vector.broadcast %38 : vector<1x32xf32> to vector<16x32xf32>
    %60 = arith.addf %58, %59 : vector<16x32xf32>
    %c264 = arith.constant 264 : index
    %c0_23 = arith.constant 0 : index
    %61 = vector.load %arg1[%c264, %c0_23] : memref<792x128xf32, #tpu.memory_space<vmem>>, vector<32x64xf32>
    %cst_24 = arith.constant dense<0.000000e+00> : vector<16x64xf32>
    %62 = tpu.matmul %60, %61, %cst_24 {dimension_numbers = #tpu.dot_dimension_numbers<[1], [0], [0], [1], [0, 0, 1, 1], [], []>} : vector<16x32xf32>, vector<32x64xf32>, vector<16x64xf32> -> vector<16x64xf32>
    %c296 = arith.constant 296 : index
    %c0_25 = arith.constant 0 : index
    %63 = vector.load %arg1[%c296, %c0_25] : memref<792x128xf32, #tpu.memory_space<vmem>>, vector<1x64xf32>
    %64 = vector.broadcast %63 : vector<1x64xf32> to vector<16x64xf32>
    %65 = arith.addf %62, %64 : vector<16x64xf32>
    %cst_26 = arith.constant 0.000000e+00 : f32
    %66 = vector.broadcast %cst_26 : f32 to vector<16x64xf32>
    %67 = arith.maximumf %65, %66 : vector<16x64xf32>
    %c304 = arith.constant 304 : index
    %c0_27 = arith.constant 0 : index
    %68 = vector.load %arg1[%c304, %c0_27] : memref<792x128xf32, #tpu.memory_space<vmem>>, vector<64x32xf32>
    %cst_28 = arith.constant dense<0.000000e+00> : vector<16x32xf32>
    %69 = tpu.matmul %67, %68, %cst_28 {dimension_numbers = #tpu.dot_dimension_numbers<[1], [0], [0], [1], [0, 0, 1, 1], [], []>} : vector<16x64xf32>, vector<64x32xf32>, vector<16x32xf32> -> vector<16x32xf32>
    %c368 = arith.constant 368 : index
    %c0_29 = arith.constant 0 : index
    %70 = vector.load %arg1[%c368, %c0_29] : memref<792x128xf32, #tpu.memory_space<vmem>>, vector<1x32xf32>
    %71 = vector.broadcast %70 : vector<1x32xf32> to vector<16x32xf32>
    %72 = arith.addf %69, %71 : vector<16x32xf32>
    %73 = arith.addf %60, %72 : vector<16x32xf32>
    %c376 = arith.constant 376 : index
    %c0_30 = arith.constant 0 : index
    %74 = vector.load %arg1[%c376, %c0_30] : memref<792x128xf32, #tpu.memory_space<vmem>>, vector<1x32xf32>
    %c384 = arith.constant 384 : index
    %c0_31 = arith.constant 0 : index
    %75 = vector.load %arg1[%c384, %c0_31] : memref<792x128xf32, #tpu.memory_space<vmem>>, vector<1x32xf32>
    %cst_32 = arith.constant dense<0.000000e+00> : vector<16xf32>
    %76 = vector.multi_reduction <add>, %73, %cst_32 [1] : vector<16x32xf32> to vector<16xf32>
    %77 = vector.shape_cast %76 : vector<16xf32> to vector<16x1xf32>
    %cst_33 = arith.constant 3.200000e+01 : f32
    %78 = vector.broadcast %cst_33 : f32 to vector<16x1xf32>
    %79 = arith.divf %77, %78 : vector<16x1xf32>
    %80 = vector.broadcast %79 : vector<16x1xf32> to vector<16x32xf32>
    %81 = arith.subf %73, %80 : vector<16x32xf32>
    %82 = arith.mulf %81, %81 : vector<16x32xf32>
    %cst_34 = arith.constant dense<0.000000e+00> : vector<16xf32>
    %83 = vector.multi_reduction <add>, %82, %cst_34 [1] : vector<16x32xf32> to vector<16xf32>
    %84 = vector.shape_cast %83 : vector<16xf32> to vector<16x1xf32>
    %cst_35 = arith.constant 3.200000e+01 : f32
    %85 = vector.broadcast %cst_35 : f32 to vector<16x1xf32>
    %86 = arith.divf %84, %85 : vector<16x1xf32>
    %87 = vector.broadcast %79 : vector<16x1xf32> to vector<16x32xf32>
    %88 = arith.subf %73, %87 : vector<16x32xf32>
    %cst_36 = arith.constant 9.99999974E-6 : f32
    %89 = vector.broadcast %cst_36 : f32 to vector<16x1xf32>
    %90 = arith.addf %86, %89 : vector<16x1xf32>
    %91 = math.rsqrt %90 : vector<16x1xf32>
    %92 = vector.broadcast %91 : vector<16x1xf32> to vector<16x32xf32>
    %93 = arith.mulf %88, %92 : vector<16x32xf32>
    %94 = vector.broadcast %74 : vector<1x32xf32> to vector<16x32xf32>
    %95 = arith.mulf %93, %94 : vector<16x32xf32>
    %96 = vector.broadcast %75 : vector<1x32xf32> to vector<16x32xf32>
    %97 = arith.addf %95, %96 : vector<16x32xf32>
    %c392 = arith.constant 392 : index
    %c0_37 = arith.constant 0 : index
    %98 = vector.load %arg1[%c392, %c0_37] : memref<792x128xf32, #tpu.memory_space<vmem>>, vector<32x96xf32>
    %cst_38 = arith.constant dense<0.000000e+00> : vector<16x96xf32>
    %99 = tpu.matmul %97, %98, %cst_38 {dimension_numbers = #tpu.dot_dimension_numbers<[1], [0], [0], [1], [0, 0, 1, 1], [], []>} : vector<16x32xf32>, vector<32x96xf32>, vector<16x96xf32> -> vector<16x96xf32>
    %c424 = arith.constant 424 : index
    %c0_39 = arith.constant 0 : index
    %100 = vector.load %arg1[%c424, %c0_39] : memref<792x128xf32, #tpu.memory_space<vmem>>, vector<1x96xf32>
    %101 = vector.broadcast %100 : vector<1x96xf32> to vector<16x96xf32>
    %102 = arith.addf %99, %101 : vector<16x96xf32>
    %103 = vector.extract_strided_slice %102 {offsets = [0, 0], sizes = [16, 32], strides = [1, 1]} : vector<16x96xf32> to vector<16x32xf32>
    %104 = vector.extract_strided_slice %102 {offsets = [0, 32], sizes = [16, 32], strides = [1, 1]} : vector<16x96xf32> to vector<16x32xf32>
    %105 = vector.extract_strided_slice %102 {offsets = [0, 64], sizes = [16, 32], strides = [1, 1]} : vector<16x96xf32> to vector<16x32xf32>
    %106 = tpu.concatenate %104, %104, %104, %104 in 0 : vector<16x32xf32>, vector<16x32xf32>, vector<16x32xf32>, vector<16x32xf32> -> vector<64x32xf32>
    %107 = arith.mulf %106, %6 : vector<64x32xf32>
    %108 = tpu.concatenate %105, %105, %105, %105 in 0 : vector<16x32xf32>, vector<16x32xf32>, vector<16x32xf32>, vector<16x32xf32> -> vector<64x32xf32>
    %109 = arith.mulf %108, %6 : vector<64x32xf32>
    %cst_40 = arith.constant dense<0.000000e+00> : vector<16x64xf32>
    %110 = tpu.matmul %103, %107, %cst_40 {dimension_numbers = #tpu.dot_dimension_numbers<[1], [1], [0], [0], [0, 0, 1, 0], [], []>} : vector<16x32xf32>, vector<64x32xf32>, vector<16x64xf32> -> vector<16x64xf32>
    %111 = arith.addf %110, %5 : vector<16x64xf32>
    %cst_41 = arith.constant dense<0xFF800000> : vector<16xf32>
    %112 = vector.multi_reduction <maximumf>, %111, %cst_41 [1] : vector<16x64xf32> to vector<16xf32>
    %113 = vector.shape_cast %112 : vector<16xf32> to vector<16x1xf32>
    %114 = vector.broadcast %113 : vector<16x1xf32> to vector<16x64xf32>
    %115 = arith.subf %111, %114 : vector<16x64xf32>
    %116 = math.exp %115 : vector<16x64xf32>
    %cst_42 = arith.constant dense<0.000000e+00> : vector<16x64xf32>
    %117 = tpu.matmul %116, %7, %cst_42 {dimension_numbers = #tpu.dot_dimension_numbers<[1], [0], [0], [1], [0, 0, 1, 1], [], []>} : vector<16x64xf32>, vector<64x64xf32>, vector<16x64xf32> -> vector<16x64xf32>
    %118 = tpu.reciprocal %117 {approx = true} : vector<16x64xf32> -> vector<16x64xf32>
    %119 = arith.mulf %116, %118 : vector<16x64xf32>
    %cst_43 = arith.constant dense<0.000000e+00> : vector<16x32xf32>
    %120 = tpu.matmul %119, %109, %cst_43 {dimension_numbers = #tpu.dot_dimension_numbers<[1], [0], [0], [1], [0, 0, 1, 1], [], []>} : vector<16x64xf32>, vector<64x32xf32>, vector<16x32xf32> -> vector<16x32xf32>
    %c432 = arith.constant 432 : index
    %c0_44 = arith.constant 0 : index
    %121 = vector.load %arg1[%c432, %c0_44] : memref<792x128xf32, #tpu.memory_space<vmem>>, vector<32x32xf32>
    %cst_45 = arith.constant dense<0.000000e+00> : vector<16x32xf32>
    %122 = tpu.matmul %120, %121, %cst_45 {dimension_numbers = #tpu.dot_dimension_numbers<[1], [0], [0], [1], [0, 0, 1, 1], [], []>} : vector<16x32xf32>, vector<32x32xf32>, vector<16x32xf32> -> vector<16x32xf32>
    %c464 = arith.constant 464 : index
    %c0_46 = arith.constant 0 : index
    %123 = vector.load %arg1[%c464, %c0_46] : memref<792x128xf32, #tpu.memory_space<vmem>>, vector<1x32xf32>
    %124 = vector.broadcast %123 : vector<1x32xf32> to vector<16x32xf32>
    %125 = arith.addf %122, %124 : vector<16x32xf32>
    %126 = arith.addf %97, %125 : vector<16x32xf32>
    %c472 = arith.constant 472 : index
    %c0_47 = arith.constant 0 : index
    %127 = vector.load %arg1[%c472, %c0_47] : memref<792x128xf32, #tpu.memory_space<vmem>>, vector<1x32xf32>
    %c480 = arith.constant 480 : index
    %c0_48 = arith.constant 0 : index
    %128 = vector.load %arg1[%c480, %c0_48] : memref<792x128xf32, #tpu.memory_space<vmem>>, vector<1x32xf32>
    %cst_49 = arith.constant dense<0.000000e+00> : vector<16xf32>
    %129 = vector.multi_reduction <add>, %126, %cst_49 [1] : vector<16x32xf32> to vector<16xf32>
    %130 = vector.shape_cast %129 : vector<16xf32> to vector<16x1xf32>
    %cst_50 = arith.constant 3.200000e+01 : f32
    %131 = vector.broadcast %cst_50 : f32 to vector<16x1xf32>
    %132 = arith.divf %130, %131 : vector<16x1xf32>
    %133 = vector.broadcast %132 : vector<16x1xf32> to vector<16x32xf32>
    %134 = arith.subf %126, %133 : vector<16x32xf32>
    %135 = arith.mulf %134, %134 : vector<16x32xf32>
    %cst_51 = arith.constant dense<0.000000e+00> : vector<16xf32>
    %136 = vector.multi_reduction <add>, %135, %cst_51 [1] : vector<16x32xf32> to vector<16xf32>
    %137 = vector.shape_cast %136 : vector<16xf32> to vector<16x1xf32>
    %cst_52 = arith.constant 3.200000e+01 : f32
    %138 = vector.broadcast %cst_52 : f32 to vector<16x1xf32>
    %139 = arith.divf %137, %138 : vector<16x1xf32>
    %140 = vector.broadcast %132 : vector<16x1xf32> to vector<16x32xf32>
    %141 = arith.subf %126, %140 : vector<16x32xf32>
    %cst_53 = arith.constant 9.99999974E-6 : f32
    %142 = vector.broadcast %cst_53 : f32 to vector<16x1xf32>
    %143 = arith.addf %139, %142 : vector<16x1xf32>
    %144 = math.rsqrt %143 : vector<16x1xf32>
    %145 = vector.broadcast %144 : vector<16x1xf32> to vector<16x32xf32>
    %146 = arith.mulf %141, %145 : vector<16x32xf32>
    %147 = vector.broadcast %127 : vector<1x32xf32> to vector<16x32xf32>
    %148 = arith.mulf %146, %147 : vector<16x32xf32>
    %149 = vector.broadcast %128 : vector<1x32xf32> to vector<16x32xf32>
    %150 = arith.addf %148, %149 : vector<16x32xf32>
    %c488 = arith.constant 488 : index
    %c0_54 = arith.constant 0 : index
    %151 = vector.load %arg1[%c488, %c0_54] : memref<792x128xf32, #tpu.memory_space<vmem>>, vector<32x64xf32>
    %cst_55 = arith.constant dense<0.000000e+00> : vector<16x64xf32>
    %152 = tpu.matmul %150, %151, %cst_55 {dimension_numbers = #tpu.dot_dimension_numbers<[1], [0], [0], [1], [0, 0, 1, 1], [], []>} : vector<16x32xf32>, vector<32x64xf32>, vector<16x64xf32> -> vector<16x64xf32>
    %c520 = arith.constant 520 : index
    %c0_56 = arith.constant 0 : index
    %153 = vector.load %arg1[%c520, %c0_56] : memref<792x128xf32, #tpu.memory_space<vmem>>, vector<1x64xf32>
    %154 = vector.broadcast %153 : vector<1x64xf32> to vector<16x64xf32>
    %155 = arith.addf %152, %154 : vector<16x64xf32>
    %cst_57 = arith.constant 0.000000e+00 : f32
    %156 = vector.broadcast %cst_57 : f32 to vector<16x64xf32>
    %157 = arith.maximumf %155, %156 : vector<16x64xf32>
    %c528 = arith.constant 528 : index
    %c0_58 = arith.constant 0 : index
    %158 = vector.load %arg1[%c528, %c0_58] : memref<792x128xf32, #tpu.memory_space<vmem>>, vector<64x32xf32>
    %cst_59 = arith.constant dense<0.000000e+00> : vector<16x32xf32>
    %159 = tpu.matmul %157, %158, %cst_59 {dimension_numbers = #tpu.dot_dimension_numbers<[1], [0], [0], [1], [0, 0, 1, 1], [], []>} : vector<16x64xf32>, vector<64x32xf32>, vector<16x32xf32> -> vector<16x32xf32>
    %c592 = arith.constant 592 : index
    %c0_60 = arith.constant 0 : index
    %160 = vector.load %arg1[%c592, %c0_60] : memref<792x128xf32, #tpu.memory_space<vmem>>, vector<1x32xf32>
    %161 = vector.broadcast %160 : vector<1x32xf32> to vector<16x32xf32>
    %162 = arith.addf %159, %161 : vector<16x32xf32>
    %163 = arith.addf %150, %162 : vector<16x32xf32>
    %c600 = arith.constant 600 : index
    %c0_61 = arith.constant 0 : index
    %164 = vector.load %arg1[%c600, %c0_61] : memref<792x128xf32, #tpu.memory_space<vmem>>, vector<1x32xf32>
    %c608 = arith.constant 608 : index
    %c0_62 = arith.constant 0 : index
    %165 = vector.load %arg1[%c608, %c0_62] : memref<792x128xf32, #tpu.memory_space<vmem>>, vector<1x32xf32>
    %cst_63 = arith.constant dense<0.000000e+00> : vector<16xf32>
    %166 = vector.multi_reduction <add>, %163, %cst_63 [1] : vector<16x32xf32> to vector<16xf32>
    %167 = vector.shape_cast %166 : vector<16xf32> to vector<16x1xf32>
    %cst_64 = arith.constant 3.200000e+01 : f32
    %168 = vector.broadcast %cst_64 : f32 to vector<16x1xf32>
    %169 = arith.divf %167, %168 : vector<16x1xf32>
    %170 = vector.broadcast %169 : vector<16x1xf32> to vector<16x32xf32>
    %171 = arith.subf %163, %170 : vector<16x32xf32>
    %172 = arith.mulf %171, %171 : vector<16x32xf32>
    %cst_65 = arith.constant dense<0.000000e+00> : vector<16xf32>
    %173 = vector.multi_reduction <add>, %172, %cst_65 [1] : vector<16x32xf32> to vector<16xf32>
    %174 = vector.shape_cast %173 : vector<16xf32> to vector<16x1xf32>
    %cst_66 = arith.constant 3.200000e+01 : f32
    %175 = vector.broadcast %cst_66 : f32 to vector<16x1xf32>
    %176 = arith.divf %174, %175 : vector<16x1xf32>
    %177 = vector.broadcast %169 : vector<16x1xf32> to vector<16x32xf32>
    %178 = arith.subf %163, %177 : vector<16x32xf32>
    %cst_67 = arith.constant 9.99999974E-6 : f32
    %179 = vector.broadcast %cst_67 : f32 to vector<16x1xf32>
    %180 = arith.addf %176, %179 : vector<16x1xf32>
    %181 = math.rsqrt %180 : vector<16x1xf32>
    %182 = vector.broadcast %181 : vector<16x1xf32> to vector<16x32xf32>
    %183 = arith.mulf %178, %182 : vector<16x32xf32>
    %184 = vector.broadcast %164 : vector<1x32xf32> to vector<16x32xf32>
    %185 = arith.mulf %183, %184 : vector<16x32xf32>
    %186 = vector.broadcast %165 : vector<1x32xf32> to vector<16x32xf32>
    %187 = arith.addf %185, %186 : vector<16x32xf32>
    %c160 = arith.constant 160 : index
    %c0_68 = arith.constant 0 : index
    %188 = vector.load %arg1[%c160, %c0_68] : memref<792x128xf32, #tpu.memory_space<vmem>>, vector<2x16xf32>
    %cst_69 = arith.constant dense<0.000000e+00> : vector<2x32xf32>
    %189 = tpu.matmul %188, %187, %cst_69 {dimension_numbers = #tpu.dot_dimension_numbers<[1], [0], [0], [1], [0, 0, 1, 1], [], []>} : vector<2x16xf32>, vector<16x32xf32>, vector<2x32xf32> -> vector<2x32xf32>
    %cst_70 = arith.constant 0.000000e+00 : f32
    %190 = vector.broadcast %cst_70 : f32 to vector<2x32xf32>
    %191 = arith.maximumf %189, %190 : vector<2x32xf32>
    %c616 = arith.constant 616 : index
    %c0_71 = arith.constant 0 : index
    %192 = vector.load %arg1[%c616, %c0_71] : memref<792x128xf32, #tpu.memory_space<vmem>>, vector<32x128xf32>
    %cst_72 = arith.constant dense<0.000000e+00> : vector<2x128xf32>
    %193 = tpu.matmul %191, %192, %cst_72 {dimension_numbers = #tpu.dot_dimension_numbers<[1], [0], [0], [1], [0, 0, 1, 1], [], []>} : vector<2x32xf32>, vector<32x128xf32>, vector<2x128xf32> -> vector<2x128xf32>
    %c648 = arith.constant 648 : index
    %c0_73 = arith.constant 0 : index
    %194 = vector.load %arg1[%c648, %c0_73] : memref<792x128xf32, #tpu.memory_space<vmem>>, vector<1x128xf32>
    %195 = vector.broadcast %194 : vector<1x128xf32> to vector<2x128xf32>
    %196 = arith.addf %193, %195 : vector<2x128xf32>
    %cst_74 = arith.constant 0.000000e+00 : f32
    %197 = vector.broadcast %cst_74 : f32 to vector<2x128xf32>
    %198 = arith.maximumf %196, %197 : vector<2x128xf32>
    %c656 = arith.constant 656 : index
    %c0_75 = arith.constant 0 : index
    %199 = vector.load %arg1[%c656, %c0_75] : memref<792x128xf32, #tpu.memory_space<vmem>>, vector<128x10xf32>
    %cst_76 = arith.constant dense<0.000000e+00> : vector<2x10xf32>
    %200 = tpu.matmul %198, %199, %cst_76 {dimension_numbers = #tpu.dot_dimension_numbers<[1], [0], [0], [1], [0, 0, 1, 1], [], []>} : vector<2x128xf32>, vector<128x10xf32>, vector<2x10xf32> -> vector<2x10xf32>
    %c784 = arith.constant 784 : index
    %c0_77 = arith.constant 0 : index
    %201 = vector.load %arg1[%c784, %c0_77] : memref<792x128xf32, #tpu.memory_space<vmem>>, vector<1x10xf32>
    %202 = vector.broadcast %201 : vector<1x10xf32> to vector<2x10xf32>
    %203 = arith.addf %200, %202 : vector<2x10xf32>
    %c0_78 = arith.constant 0 : index
    %c0_79 = arith.constant 0 : index
    %204 = vector.load %arg2[%c0_78, %c0_79] : memref<2x10xf32, #tpu.memory_space<vmem>>, vector<2x10xf32>
    tpu.vector_store %arg2[%c0_78, %c0_79], %203 {strides = array<i32>} : memref<2x10xf32, #tpu.memory_space<vmem>>, vector<2x10xf32>,
    return
  }
}

</mosaic_0001>

<bundles_post_ra>
// kernel: tpu_custom_call.1
= control target key start
LH: loop header
LB: loop body
LE: loop exit
PB: predicated region body
PF: predicated region fallthrough
CT: control target
= control target key end

     0   :  { %7 = vsyncpa [#allocation3], 0  ;;  %s2955_s0 = inlined_call_operand.hbm [shape: f32[16,32], index: 0, kind: input, shape index: {}]   ;;  %s2956_s1 = inlined_call_operand.hbm [shape: f32[792,128], index: 1, kind: input, shape index: {}]   ;;  %s2957_s2 = inlined_call_operand.hbm [shape: f32[2,10], index: 2, kind: output, shape index: {}]  }
   0x1   :  { %8 = vsyncpa [#allocation6], 0 }
   0x2   :  { %9 = vsyncpa [#allocation4], 0  ;;  %s2571_s9 = smov [#allocation2]  }
   0x3   :  { %s15_s10 = sshll.u32 %s2571_s9, 4  ;;  %s16_s10 = int_to_ptr.vmem [resolvable:$true] %s15_s10 }
   0x4   :  { %s2513_s11 = scalar_lea.vmem %s16_s10, 256  ;;  %p2518_p1 = scmp.lt.s32.totalorder %s16_s10, %s16_s10 }
   0x5   :  { %p2514_p0 = scmp.ne.s32.totalorder %s16_s10, %s2513_s11  ;;  %p2519_p2 = scmp.lt.s32.totalorder %s2513_s11, %s2513_s11 }
   0x7   :  { %p2520_p3 = por %p2519_p2, %p2518_p1 }
   0x9   :  { %p2521_p4 = pnand %p2520_p3, %p2514_p0 }
   0xb   :  { %2524 = shalt.err (!%p2521_p4)
}
   0xc   :  { %s2572_s12 = smov 128   ;;  %s2573_s13 = smov 8  }
   0xd   :  { %21 = dma.hbm_to_vmem [thread:$0]  %s2955_s0, 256, %s16_s10, [#allocation3], %s2572_s12, %s2572_s12, %s2573_s13  }
   0xe   :  { %s2574_s16 = smov [#allocation5]  }
   0xf   :  { %s27_s17 = sshll.u32 %s2574_s16, 4  ;;  %s28_s17 = int_to_ptr.vmem [resolvable:$true] %s27_s17 }
  0x10   :  { %s2533_s18 = scalar_lea.vmem %s28_s17, 12672  ;;  %p2538_p6 = scmp.lt.s32.totalorder %s28_s17, %s28_s17 }
  0x11   :  { %p2534_p5 = scmp.ne.s32.totalorder %s28_s17, %s2533_s18  ;;  %p2539_p7 = scmp.lt.s32.totalorder %s2533_s18, %s2533_s18 }
  0x13   :  { %p2540_p8 = por %p2539_p7, %p2538_p6 }
  0x15   :  { %p2541_p9 = pnand %p2540_p8, %p2534_p5 }
  0x17   :  { %2544 = shalt.err (!%p2541_p9)
}
  0x18   :  { %33 = dma.hbm_to_vmem [thread:$0]  %s2956_s1, 12672, %s28_s17, [#allocation6], %s2572_s12, %s2572_s12, %s2573_s13  }
  0x19   :  { %2565 = dma.done.wait [#allocation3], 256  }
  0x1a   :  { %2566 = vsyncadd [#allocation3], 4294967040 }
  0x1b   :  { %2567 = dma.done.wait [#allocation6], 12672  }
  0x1c   :  { %2568 = vsyncadd [#allocation6], 4294954624  ;;  %v69_v0 = vld [vmem:[#allocation5 + $0xc0] sm:$0xff]  ;;  %v68_v1 = vld [vmem:[#allocation5 + $0xb8] sm:$0xff]  ;;  %vm75_vm0 = vcmask 261120   ;;  %s2575_s0 = smov 32  }
  0x1d   :  { %2192 = vmatprep.subr.mxu0 %v69_v0  ;;  %v67_v2 = vld [vmem:[#allocation5 + $0xb0] sm:$0xff]  ;;  %v44_v4 = vld [vmem:[#allocation5] sm:$0xff]  ;;  %v41_v6 = vld [vmem:[#allocation2 + $0x8] sm:$0xff]  ;;  %s2576_s1 = smov 96   ;;  %vm350_vm1 = vcmask 523264   ;;  %s2577_s21 = smov 64  }
  0x1e   :  { %v40_v3 = vld [vmem:[#allocation2] sm:$0xff]  ;;  %2193 = vmatpush3.msra.mxu0 %v69_v0  ;;  %v45_v7 = vld [vmem:[#allocation5 + $0x8] sm:$0xff]  ;;  %v2602_v8 = vld [vmem:[#allocation5 + $0x58] sm:$0xff]  ;;  %v43_v9 = vmul.f32 2.0, %v41_v6  ;;  %vm2579_vm2 = vmmov 0   ;;  %vm1720_vm3 = vcmask 130048  }
  0x1f   :  { %v42_v5 = vmul.f32 2.0, %v40_v3  ;;  %2194 = vmatprep.subr.mxu0 %v68_v1  ;;  %179 = vrot.lane.b32.xlu0 %v2602_v8, %s2575_s0  ;;  %v2605_v10 = vld [vmem:[#allocation5 + $0x48] sm:$0xff]  ;;  %v2610_v13 = vld [vmem:[#allocation5 + $0x50] sm:$0xff]  ;;  %v2614_v15 = vld [vmem:[#allocation5 + $0x40] sm:$0xff]  ;;  %s2580_s22 = smov [#allocation7]   ;;  %vm1969_vm4 = vcmask 74752  }
  0x20   :  { %2195 = vmatpush3.msra.mxu0 %v68_v1  ;;  %v66_v11 = vld [vmem:[#allocation5 + $0xa8] sm:$0xff]  ;;  %175 = vrot.lane.b32.xlu1 %v2605_v10, %s2575_s0  ;;  %v2612_v14 = vadd.f32 %v45_v7, %v43_v9  ;;  %v2620_v16 = vld [vmem:[#allocation5 + $0x38] sm:$0xff]  ;;  %v2624_v17 = vld [vmem:[#allocation5 + $0x30] sm:$0xff]  ;;  %s1977_s23 = sshll.u32 %s2580_s22, 4  ;;  %s1978_s23 = int_to_ptr.vmem [resolvable:$true] %s1977_s23 }
  0x21   :  { %v2607_v12 = vadd.f32 %v44_v4, %v42_v5  ;;  %2196 = vmatprep.subr.mxu0 %v67_v2  ;;  %v2628_v18 = vld [vmem:[#allocation5 + $0x28] sm:$0xff]  ;;  %v2630_v19 = vld [vmem:[#allocation5 + $0x20] sm:$0xff]  ;;  %v2698_v49 = vld [vmem:[#allocation5 + $0x18] sm:$0xff]  ;;  %s2545_s24 = scalar_lea.vmem %s1978_s23, 32  ;;  %p2550_p11 = scmp.lt.s32.totalorder %s1978_s23, %s1978_s23 }
  0x22   :  { %2197 = vmatpush3.msra.mxu0 %v67_v2  ;;  %v1987_v22 = vld [vmem:[#allocation5 + $0xc8] ss:$0 sm:$0xff]  ;;  %v2700_v51 = vld [vmem:[#allocation5 + $0x10] sm:$0xff]  ;;  %v2706_v57 = vld [vmem:[#allocation5 + $0x98] sm:$0xff]  ;;  %p2546_p10 = scmp.ne.s32.totalorder %s1978_s23, %s2545_s24  ;;  %p2551_p12 = scmp.lt.s32.totalorder %s2545_s24, %s2545_s24 }
  0x23   :  { %2200 = vmatprep.mubr.msk.f32.mxu0 %vm75_vm0, %v2607_v12  ;;  %2198 = vmatprep.subr.mxu0 %v66_v11  ;;  %v2709_v58 = vld [vmem:[#allocation5 + $0x90] sm:$0xff]  ;;  %v2715_v59 = vld [vmem:[#allocation5 + $0x88] sm:$0xff]  ;;  %v2719_v60 = vld [vmem:[#allocation5 + $0x80] sm:$0xff] }
  0x24   :  { %177 = vrot.lane.b32.xlu0 %v2610_v13, %s2575_s0  ;;  %2199 = vmatpush3.msra.mxu0 %v66_v11  ;;  %v2725_v61 = vld [vmem:[#allocation5 + $0x78] sm:$0xff]  ;;  %v2731_v62 = vld [vmem:[#allocation5 + $0x70] sm:$0xff]  ;;  %v2737_v63 = vld [vmem:[#allocation5 + $0x68] sm:$0xff]  ;;  %p2552_p13 = por %p2551_p12, %p2550_p11 }
  0x25   :  { %173 = vrot.lane.b32.xlu1 %v2614_v15, %s2575_s0  ;;  %2201 = vmatmul.mubr.msk.f32.vlgmr.msra.gmra.mxu0 %vm75_vm0, %v2612_v14  ;;  %v2743_v0 = vld [vmem:[#allocation5 + $0x60] sm:$0xff] }
  0x26   :  { %2222 = vmatprep.subr.mxu0 %v2706_v57  ;;  %p2553_p0 = pnand %p2552_p13, %p2546_p10 }
  0x27   :  { %2223 = vmatpush3.msra.mxu0 %v2706_v57 }
  0x28   :  { %171 = vrot.lane.b32.xlu0 %v2620_v16, %s2575_s0  ;;  %2224 = vmatprep.subr.mxu0 %v2709_v58 }
  0x29   :  { %169 = vrot.lane.b32.xlu1 %v2624_v17, %s2575_s0  ;;  %2225 = vmatpush3.msra.mxu0 %v2709_v58 }
  0x2a   :  { %2226 = vmatprep.subr.mxu0 %v2715_v59 }
  0x2b   :  { %2227 = vmatpush3.msra.mxu0 %v2715_v59 }
  0x2c   :  { %167 = vrot.lane.b32.xlu0 %v2628_v18, %s2575_s0  ;;  %2228 = vmatprep.subr.mxu0 %v2719_v60 }
  0x2d   :  { %165 = vrot.lane.b32.xlu1 %v2630_v19, %s2575_s0  ;;  %2229 = vmatpush3.msra.mxu0 %v2719_v60 }
  0x2e   :  { %2230 = vmatprep.subr.mxu0 %v2725_v61 }
  0x2f   :  { %2231 = vmatpush3.msra.mxu0 %v2725_v61 }
  0x30   :  { %2232 = vmatprep.subr.mxu0 %v2731_v62 }
  0x31   :  { %2233 = vmatpush3.msra.mxu0 %v2731_v62 }
  0x32   :  { %2234 = vmatprep.subr.mxu0 %v2737_v63 }
  0x33   :  { %2235 = vmatpush3.msra.mxu0 %v2737_v63 }
  0x34   :  { %2236 = vmatprep.subr.mxu0 %v2743_v0 }
  0x35   :  { %2237 = vmatpush3.msra.mxu0 %v2743_v0 }
  0x91   :  { %v2634_v20 = vpop.permute.xlu0 %179 }
  0x92   :  { %v2636_v21 = vpop.permute.xlu1 %175 }
  0x96   :  { %v2638_v23 = vpop.permute.xlu0 %177 }
  0x97   :  { %v2642_v26 = vpop.permute.xlu1 %173 }
  0x9a   :  { %v2653_v31 = vpop.permute.xlu0 %171 }
  0x9b   :  { %v2658_v33 = vpop.permute.xlu1 %169 }
  0x9e   :  { %v2666_v36 = vpop.permute.xlu0 %167 }
  0x9f   :  { %v2671_v38 = vpop.permute.xlu1 %165 }
  0xe5   :  { %v2202_v24 = vpop.f32.mrf.mxu0 }
  0xe6   :  { %v2640_v25 = vadd.f32 %v2202_v24, %v1987_v22 }
  0xe7   :  { %v148_v27 = vpop.f32.mrf.mxu0 }
  0xe8   :  { %v2644_v28 = vadd.f32 %v1987_v22, %v148_v27  ;;  %v196_v29 = vmul.f32 %v2634_v20, %v2640_v25  ;;  %v194_v32 = vmul.f32 %v2636_v21, %v2640_v25  ;;  %v192_v35 = vmul.f32 %v2653_v31, %v2640_v25 }
  0xe9   :  { %v190_v39 = vmul.f32 %v2666_v36, %v2640_v25 }
  0xea   :  { %251 = vrot.lane.b32.xlu0 %v196_v29, %s2576_s1  ;;  %2219 = vmatprep.mubr.msk.f32.mxu1 %vm75_vm0, %v2644_v28  ;;  %v195_v30 = vmul.f32 %v2638_v23, %v2644_v28  ;;  %v193_v34 = vmul.f32 %v2642_v26, %v2644_v28  ;;  %v191_v37 = vmul.f32 %v2658_v33, %v2644_v28 }
  0xeb   :  { %v189_v40 = vmul.f32 %v2671_v38, %v2644_v28 }
  0xec   :  { %249 = vrot.lane.b32.xlu1 %v195_v30, %s2576_s1 }
  0xee   :  { %247 = vrot.lane.b32.xlu0 %v194_v32, %s2576_s1 }
  0xf0   :  { %245 = vrot.lane.b32.xlu1 %v193_v34, %s2576_s1 }
  0xf2   :  { %243 = vrot.lane.b32.xlu0 %v192_v35, %s2576_s1  ;;  %v564_v35 = vld [vmem:[#allocation5 + $0xe8] sm:$0xff] }
  0xf4   :  { %241 = vrot.lane.b32.xlu1 %v191_v37, %s2576_s1  ;;  %v563_v37 = vld [vmem:[#allocation5 + $0xe0] sm:$0xff] }
  0xf6   :  { %239 = vrot.lane.b32.xlu0 %v190_v39, %s2576_s1 }
  0xf8   :  { %237 = vrot.lane.b32.xlu1 %v189_v40, %s2576_s1 }
 0x15c   :  { %v252_v41 = vpop.permute.xlu0 %251 }
 0x15d   :  { %2203 = vmatprep.subr.msk.mxu1 %vm75_vm0, %v252_v41 }
 0x15e   :  { %2204 = vmatpush3.xpose.msk.msra.mxu1 %vm75_vm0, %v252_v41  ;;  %v250_v42 = vpop.permute.xlu1 %249 }
 0x15f   :  { %2205 = vmatprep.subr.msk.mxu1 %vm75_vm0, %v250_v42 }
 0x160   :  { %v248_v43 = vpop.permute.xlu0 %247 }
 0x162   :  { %2206 = vmatpush3.xpose.msk.msra.mxu1 %vm75_vm0, %v250_v42  ;;  %v246_v44 = vpop.permute.xlu1 %245 }
 0x163   :  { %2207 = vmatprep.subr.msk.mxu1 %vm75_vm0, %v248_v43 }
 0x164   :  { %v244_v45 = vpop.permute.xlu0 %243 }
 0x166   :  { %2208 = vmatpush3.xpose.msk.msra.mxu1 %vm75_vm0, %v248_v43  ;;  %v242_v46 = vpop.permute.xlu1 %241 }
 0x167   :  { %2209 = vmatprep.subr.msk.mxu1 %vm75_vm0, %v246_v44 }
 0x168   :  { %v240_v47 = vpop.permute.xlu0 %239 }
 0x16a   :  { %2210 = vmatpush3.xpose.msk.msra.mxu1 %vm75_vm0, %v246_v44  ;;  %v238_v48 = vpop.permute.xlu1 %237 }
 0x16b   :  { %2211 = vmatprep.subr.msk.mxu1 %vm75_vm0, %v244_v45 }
 0x16e   :  { %2212 = vmatpush3.xpose.msk.msra.mxu1 %vm75_vm0, %v244_v45 }
 0x16f   :  { %2213 = vmatprep.subr.msk.mxu1 %vm75_vm0, %v242_v46 }
 0x172   :  { %2214 = vmatpush3.xpose.msk.msra.mxu1 %vm75_vm0, %v242_v46 }
 0x173   :  { %2215 = vmatprep.subr.msk.mxu1 %vm75_vm0, %v240_v47 }
 0x176   :  { %2216 = vmatpush3.xpose.msk.msra.mxu1 %vm75_vm0, %v240_v47 }
 0x177   :  { %2217 = vmatprep.subr.msk.mxu1 %vm75_vm0, %v238_v48 }
 0x17a   :  { %2218 = vmatpush3.xpose.msk.msra.mxu1 %vm75_vm0, %v238_v48 }
 0x17b   :  { %2260 = vmatprep.subr.mxu1 %v564_v35 }
 0x17d   :  { %2220 = vmatmul.mubr.msk.f32.vlgmr.msra.gmra.mxu1 %vm75_vm0, %v2640_v25 }
 0x17e   :  { %2261 = vmatpush3.msra.mxu1 %v564_v35 }
 0x17f   :  { %2262 = vmatprep.subr.mxu1 %v563_v37 }
 0x180   :  { %2263 = vmatpush3.msra.mxu1 %v563_v37 }
 0x23d   :  { %v2221_v50 = vpop.f32.mrf.mxu1 }
 0x23e   :  { %v347_v52 = vadd.f32 %v2221_v50, %v2698_v49 }
 0x23f   :  { %v341_v53 = vpop.f32.mrf.mxu1 }
 0x240   :  { %v342_v54 = vadd.f32 %v341_v53, %v2700_v51  ;;  %v354_v55 = vsel %vm350_vm1, %v347_v52, -inf  ;;  %v562_v53 = vld [vmem:[#allocation5 + $0xd8] sm:$0xff] }
 0x241   :  { %355 = vmax.xlane.f32.xlu1 %v354_v55  ;;  %2264 = vmatprep.subr.mxu1 %v562_v53 }
 0x242   :  { %v351_v56 = vsel %vm350_vm1, %v342_v54, -inf  ;;  %2265 = vmatpush3.msra.mxu1 %v562_v53  ;;  %v790_v53 = vld [vmem:[#allocation5 + $0x150] sm:$0xff] }
 0x243   :  { %352 = vmax.xlane.f32.xlu0 %v351_v56 }
 0x252   :  { %209 = vrot.lane.b32.xlu1 %v2610_v13, %s2577_s21 }
 0x256   :  { %205 = vrot.lane.b32.xlu1 %v2614_v15, %s2577_s21 }
 0x259   :  { %211 = vrot.lane.b32.xlu0 %v2602_v8, %s2577_s21 }
 0x25a   :  { %201 = vrot.lane.b32.xlu1 %v2624_v17, %s2577_s21 }
 0x25d   :  { %207 = vrot.lane.b32.xlu0 %v2605_v10, %s2577_s21 }
 0x25e   :  { %197 = vrot.lane.b32.xlu1 %v2630_v19, %s2577_s21 }
 0x261   :  { %203 = vrot.lane.b32.xlu0 %v2620_v16, %s2577_s21 }
 0x265   :  { %199 = vrot.lane.b32.xlu0 %v2628_v18, %s2577_s21 }
 0x2ca   :  { %v356_v1 = vpop.xlane.xlu1 %355 }
 0x2cb   :  { %v358_v2 = vsub.f32 %v347_v52, %v356_v1 }
 0x2cc   :  { %v353_v3 = vpop.xlane.xlu0 %352 }
 0x2cd   :  { %v357_v4 = vsub.f32 %v342_v54, %v353_v3  ;;  %v361_v5 = vmul.f32 1.442695, %v358_v2  ;;  %v561_v54 = vld [vmem:[#allocation5 + $0xd0] sm:$0xff] }
 0x2ce   :  { %v2754_v6 = vpop.permute.xlu1 %209  ;;  %2266 = vmatprep.subr.mxu1 %v561_v54 }
 0x2cf   :  { %v359_v7 = vmul.f32 1.442695, %v357_v4  ;;  %v227_v8 = vmul.f32 %v2754_v6, %v2644_v28  ;;  %2267 = vmatpush3.msra.mxu1 %v561_v54  ;;  %v789_v54 = vld [vmem:[#allocation5 + $0x148] sm:$0xff] }
 0x2d0   :  { %v2758_v9 = vpop.permute.xlu0 %211  ;;  %2331 = vmatprep.subr.mxu1 %v2706_v57 }
 0x2d1   :  { %2473 = vpow2.f32 %v359_v7  ;;  %v228_v10 = vmul.f32 %v2758_v9, %v2640_v25  ;;  %468 = vrot.lane.b32.xlu1 %v227_v8, %s2577_s21 }
 0x2d2   :  { %2475 = vpow2.f32 %v361_v5  ;;  %v2763_v11 = vpop.permute.xlu1 %205 }
 0x2d3   :  { %v225_v13 = vmul.f32 %v2763_v11, %v2644_v28  ;;  %470 = vrot.lane.b32.xlu0 %v228_v10, %s2577_s21 }
 0x2d4   :  { %v2768_v15 = vpop.permute.xlu0 %207 }
 0x2d5   :  { %v226_v16 = vmul.f32 %v2768_v15, %v2640_v25  ;;  %464 = vrot.lane.b32.xlu1 %v225_v13, %s2577_s21 }
 0x2d6   :  { %v2773_v17 = vpop.permute.xlu1 %201 }
 0x2d7   :  { %v223_v18 = vmul.f32 %v2773_v17, %v2644_v28  ;;  %466 = vrot.lane.b32.xlu0 %v226_v16, %s2577_s21 }
 0x2d8   :  { %v2778_v19 = vpop.permute.xlu0 %203 }
 0x2d9   :  { %v224_v22 = vmul.f32 %v2778_v19, %v2640_v25  ;;  %460 = vrot.lane.b32.xlu1 %v223_v18, %s2577_s21  ;;  %v697_v18 = vld [vmem:[#allocation5 + $0x120] sm:$0xff] }
 0x2da   :  { %v2783_v24 = vpop.permute.xlu1 %197 }
 0x2db   :  { %v221_v27 = vmul.f32 %v2783_v24, %v2644_v28  ;;  %462 = vrot.lane.b32.xlu0 %v224_v22, %s2577_s21  ;;  %v695_v22 = vld [vmem:[#allocation5 + $0x110] sm:$0xff] }
 0x2dc   :  { %v2788_v29 = vpop.permute.xlu0 %199 }
 0x2dd   :  { %v222_v30 = vmul.f32 %v2788_v29, %v2640_v25  ;;  %456 = vrot.lane.b32.xlu1 %v221_v27, %s2577_s21  ;;  %v694_v27 = vld [vmem:[#allocation5 + $0x108] sm:$0xff] }
 0x2de   :  { %v2474_v32 = vpop.eup %2473 }
 0x2df   :  { %v2476_v34 = vpop.eup %2475  ;;  %2238 = vmatprep.mubr.msk.f32.mxu0 %vm350_vm1, %v2474_v32  ;;  %458 = vrot.lane.b32.xlu0 %v222_v30, %s2577_s21  ;;  %v793_v30 = vld [vmem:[#allocation5 + $0x168] sm:$0xff] }
 0x2e0   :  { %2239 = vmatmul.mubr.msk.f32.vlgmr.msra.gmra.mxu0 %vm350_vm1, %v2476_v34 }
 0x343   :  { %v469_v28 = vpop.permute.xlu1 %468 }
 0x345   :  { %v471_v39 = vpop.permute.xlu0 %470 }
 0x346   :  { %2241 = vmatprep.subr.mxu0 %v471_v39 }
 0x347   :  { %v465_v25 = vpop.permute.xlu1 %464  ;;  %2242 = vmatpush3.msra.mxu0 %v471_v39 }
 0x348   :  { %2243 = vmatprep.subr.mxu0 %v469_v28 }
 0x349   :  { %2244 = vmatpush3.msra.mxu0 %v469_v28  ;;  %v467_v40 = vpop.permute.xlu0 %466 }
 0x34a   :  { %2245 = vmatprep.subr.mxu0 %v467_v40 }
 0x34b   :  { %2246 = vmatpush3.msra.mxu0 %v467_v40  ;;  %v461_v41 = vpop.permute.xlu1 %460  ;;  %v2007_v40 = vld [vmem:[#allocation5 + $0xf8] ss:$0 sm:$0xff] }
 0x34c   :  { %2247 = vmatprep.subr.mxu0 %v465_v25 }
 0x34d   :  { %2248 = vmatpush3.msra.mxu0 %v465_v25  ;;  %v463_v42 = vpop.permute.xlu0 %462 }
 0x34e   :  { %2249 = vmatprep.subr.mxu0 %v463_v42 }
 0x34f   :  { %2250 = vmatpush3.msra.mxu0 %v463_v42  ;;  %v457_v44 = vpop.permute.xlu1 %456  ;;  %v2008_v42 = vld [vmem:[#allocation5 + $0x100] ss:$0 sm:$0xff] }
 0x350   :  { %2251 = vmatprep.subr.mxu0 %v461_v41 }
 0x351   :  { %2252 = vmatpush3.msra.mxu0 %v461_v41  ;;  %v459_v43 = vpop.permute.xlu0 %458 }
 0x352   :  { %2253 = vmatprep.subr.mxu0 %v459_v43 }
 0x353   :  { %2254 = vmatpush3.msra.mxu0 %v459_v43 }
 0x354   :  { %2255 = vmatprep.subr.mxu0 %v457_v44 }
 0x355   :  { %2256 = vmatpush3.msra.mxu0 %v457_v44 }
 0x356   :  { %2271 = vmatprep.subr.mxu0 %v697_v18 }
 0x3a0   :  { %v2240_v45 = vpop.f32.mrf.mxu0 }
 0x3a1   :  { %2477 = vrcp.f32 %v2240_v45 }
 0x3a2   :  { %v435_v46 = vpop.f32.mrf.mxu0 }
 0x3a3   :  { %2479 = vrcp.f32 %v435_v46 }
 0x3ae   :  { %v2478_v47 = vpop.eup %2477 }
 0x3af   :  { %v447_v52 = vmul.f32 %v2478_v47, %v2476_v34 }
 0x3b0   :  { %v2480_v48 = vpop.eup %2479 }
 0x3b1   :  { %v446_v50 = vmul.f32 %v2480_v48, %v2474_v32 }
 0x3b3   :  { %2257 = vmatprep.mubr.msk.f32.mxu0 %vm350_vm1, %v446_v50  ;;  %v792_v50 = vld [vmem:[#allocation5 + $0x160] sm:$0xff] }
 0x3b4   :  { %2258 = vmatmul.mubr.msk.f32.vlgmr.msra.gmra.mxu0 %vm350_vm1, %v447_v52  ;;  %v791_v52 = vld [vmem:[#allocation5 + $0x158] sm:$0xff] }
 0x3b5   :  { %2272 = vmatpush3.msra.mxu0 %v697_v18 }
 0x474   :  { %v2259_v55 = vpop.f32.mrf.mxu0 }
 0x476   :  { %v552_v56 = vpop.f32.mrf.mxu0 }
 0x477   :  { %2268 = vmatprep.mubr.msk.f32.mxu1 %vm75_vm0, %v552_v56  ;;  %v787_v56 = vld [vmem:[#allocation5 + $0x138] sm:$0xff] }
 0x478   :  { %2269 = vmatmul.mubr.msk.f32.vlgmr.msra.gmra.mxu1 %vm75_vm0, %v2259_v55  ;;  %v788_v55 = vld [vmem:[#allocation5 + $0x140] sm:$0xff] }
 0x479   :  { %2332 = vmatpush3.msra.mxu1 %v2706_v57  ;;  %v2004_v57 = vld [vmem:[#allocation5 + $0xf0] ss:$0 sm:$0xff] }
 0x47a   :  { %2333 = vmatprep.subr.mxu1 %v2709_v58 }
 0x47b   :  { %2334 = vmatpush3.msra.mxu1 %v2709_v58 }
 0x47c   :  { %2335 = vmatprep.subr.mxu1 %v2715_v59 }
 0x47d   :  { %2336 = vmatpush3.msra.mxu1 %v2715_v59 }
 0x47e   :  { %2337 = vmatprep.subr.mxu1 %v2719_v60 }
 0x47f   :  { %2338 = vmatpush3.msra.mxu1 %v2719_v60 }
 0x480   :  { %2339 = vmatprep.subr.mxu1 %v2725_v61 }
 0x481   :  { %2340 = vmatpush3.msra.mxu1 %v2725_v61 }
 0x482   :  { %2341 = vmatprep.subr.mxu1 %v2731_v62 }
 0x483   :  { %2342 = vmatpush3.msra.mxu1 %v2731_v62 }
 0x484   :  { %2343 = vmatprep.subr.mxu1 %v2737_v63 }
 0x485   :  { %2344 = vmatpush3.msra.mxu1 %v2737_v63 }
 0x486   :  { %2345 = vmatprep.subr.mxu1 %v2743_v0 }
 0x487   :  { %2346 = vmatpush3.msra.mxu1 %v2743_v0 }
 0x538   :  { %v2270_v58 = vpop.f32.mrf.mxu1 }
 0x539   :  { %v648_v59 = vadd.f32 %v2270_v58, %v2004_v57  ;;  %v2009_v58 = vld [vmem:[#allocation5 + $0x128] ss:$0 sm:$0xff] }
 0x53a   :  { %v642_v60 = vpop.f32.mrf.mxu1 }
 0x53b   :  { %v643_v1 = vadd.f32 %v2004_v57, %v642_v60  ;;  %v652_v2 = vadd.f32 %v648_v59, %v2612_v14  ;;  %v786_v57 = vld [vmem:[#allocation5 + $0x130] sm:$0xff] }
 0x53d   :  { %v658_v61 = vsel %vm75_vm0, %v652_v2, 0.0  ;;  %v651_v3 = vadd.f32 %v643_v1, %v2607_v12  ;;  %v696_v12 = vld [vmem:[#allocation5 + $0x118] sm:$0xff] }
 0x53e   :  { %659 = vadd.xlane.f32.xlu1 %v658_v61  ;;  %2273 = vmatprep.subr.mxu0 %v696_v12 }
 0x53f   :  { %v655_v62 = vsel %vm75_vm0, %v651_v3, 0.0  ;;  %2274 = vmatpush3.msra.mxu0 %v696_v12 }
 0x540   :  { %656 = vadd.xlane.f32.xlu0 %v655_v62  ;;  %2275 = vmatprep.subr.mxu0 %v695_v22  ;;  %v2012_v62 = vld [vmem:[#allocation5 + $0x170] ss:$0 sm:$0xff] }
 0x541   :  { %2276 = vmatpush3.msra.mxu0 %v695_v22 }
 0x542   :  { %2277 = vmatprep.subr.mxu0 %v694_v27 }
 0x543   :  { %2278 = vmatpush3.msra.mxu0 %v694_v27 }
 0x544   :  { %2282 = vmatprep.subr.mxu0 %v793_v30 }
 0x5c7   :  { %v660_v63 = vpop.xlane.xlu1 %659 }
 0x5c8   :  { %v663_v4 = vmul.f32 0.03125, %v660_v63 }
 0x5c9   :  { %v657_v5 = vpop.xlane.xlu0 %656 }
 0x5ca   :  { %v662_v7 = vmul.f32 0.03125, %v657_v5  ;;  %v665_v0 = vsub.f32 %v652_v2, %v663_v4 }
 0x5cc   :  { %v664_v8 = vsub.f32 %v651_v3, %v662_v7  ;;  %v667_v16 = vmul.f32 %v665_v0, %v665_v0 }
 0x5ce   :  { %v666_v10 = vmul.f32 %v664_v8, %v664_v8  ;;  %v671_v14 = vsel %vm75_vm0, %v667_v16, 0.0 }
 0x5d0   :  { %v668_v13 = vsel %vm75_vm0, %v666_v10, 0.0 }
 0x5d1   :  { %669 = vadd.xlane.f32.xlu0 %v668_v13 }
 0x5d5   :  { %672 = vadd.xlane.f32.xlu0 %v671_v14 }
 0x65a   :  { %v670_v32 = vpop.xlane.xlu0 %669 }
 0x65b   :  { %v674_v34 = vmul.f32 0.03125, %v670_v32 }
 0x65d   :  { %v676_v35 = vadd.f32 1e-05, %v674_v34 }
 0x65e   :  { %v673_v37 = vpop.xlane.xlu0 %672 }
 0x65f   :  { %2481 = vrsqrt.f32 %v676_v35  ;;  %v675_v28 = vmul.f32 0.03125, %v673_v37  ;;  %v925_v37 = vld [vmem:[#allocation5 + $0x1a0] sm:$0xff] }
 0x661   :  { %v677_v39 = vadd.f32 1e-05, %v675_v28  ;;  %v924_v28 = vld [vmem:[#allocation5 + $0x198] sm:$0xff] }
 0x663   :  { %2483 = vrsqrt.f32 %v677_v39  ;;  %v923_v39 = vld [vmem:[#allocation5 + $0x190] sm:$0xff] }
 0x66c   :  { %v2482_v25 = vpop.eup %2481 }
 0x66d   :  { %v680_v41 = vmul.f32 %v2482_v25, %v664_v8  ;;  %v922_v25 = vld [vmem:[#allocation5 + $0x188] sm:$0xff] }
 0x66f   :  { %v686_v43 = vmul.f32 %v2007_v40, %v680_v41 }
 0x670   :  { %v2484_v44 = vpop.eup %2483 }
 0x671   :  { %v681_v45 = vmul.f32 %v2484_v44, %v665_v0  ;;  %v692_v46 = vadd.f32 %v2008_v42, %v686_v43 }
 0x673   :  { %v687_v47 = vmul.f32 %v2007_v40, %v681_v45  ;;  %2279 = vmatprep.mubr.msk.f32.mxu0 %vm75_vm0, %v692_v46 }
 0x675   :  { %v693_v48 = vadd.f32 %v2008_v42, %v687_v47  ;;  %v2015_v47 = vld [vmem:[#allocation5 + $0x178] ss:$0 sm:$0xff] }
 0x677   :  { %2280 = vmatmul.mubr.msk.f32.vlgmr.msra.gmra.mxu0 %vm75_vm0, %v693_v48 }
 0x678   :  { %2283 = vmatpush3.msra.mxu0 %v793_v30 }
 0x679   :  { %2284 = vmatprep.subr.mxu0 %v792_v50 }
 0x67a   :  { %2285 = vmatpush3.msra.mxu0 %v792_v50 }
 0x67b   :  { %2286 = vmatprep.subr.mxu0 %v791_v52 }
 0x67c   :  { %2287 = vmatpush3.msra.mxu0 %v791_v52 }
 0x67d   :  { %2288 = vmatprep.subr.mxu0 %v790_v53 }
 0x67e   :  { %2289 = vmatpush3.msra.mxu0 %v790_v53 }
 0x67f   :  { %2290 = vmatprep.subr.mxu0 %v789_v54 }
 0x680   :  { %2291 = vmatpush3.msra.mxu0 %v789_v54  ;;  %v2016_v54 = vld [vmem:[#allocation5 + $0x180] ss:$0 sm:$0xff] }
 0x681   :  { %2292 = vmatprep.subr.mxu0 %v788_v55 }
 0x682   :  { %2293 = vmatpush3.msra.mxu0 %v788_v55 }
 0x683   :  { %2294 = vmatprep.subr.mxu0 %v787_v56 }
 0x684   :  { %2295 = vmatpush3.msra.mxu0 %v787_v56 }
 0x685   :  { %2296 = vmatprep.subr.mxu0 %v786_v57 }
 0x686   :  { %2297 = vmatpush3.msra.mxu0 %v786_v57 }
 0x687   :  { %2301 = vmatprep.subr.mxu0 %v925_v37 }
 0x737   :  { %v2281_v59 = vpop.f32.mrf.mxu0 }
 0x738   :  { %v781_v60 = vadd.f32 %v2281_v59, %v2009_v58 }
 0x739   :  { %v775_v1 = vpop.f32.mrf.mxu0 }
 0x73a   :  { %v776_v2 = vadd.f32 %v2009_v58, %v775_v1  ;;  %v785_v3 = vmax.f32 %v781_v60, 0.0  ;;  %v2017_v58 = vld [vmem:[#allocation5 + $0x1a8] ss:$0 sm:$0xff] }
 0x73c   :  { %v784_v61 = vmax.f32 %v776_v2, 0.0 }
 0x73e   :  { %2298 = vmatprep.mubr.msk.f32.mxu0 %vm350_vm1, %v784_v61 }
 0x73f   :  { %2299 = vmatmul.mubr.msk.f32.vlgmr.msra.gmra.mxu0 %vm350_vm1, %v785_v3 }
 0x740   :  { %2302 = vmatpush3.msra.mxu0 %v925_v37 }
 0x741   :  { %2303 = vmatprep.subr.mxu0 %v924_v28 }
 0x742   :  { %2304 = vmatpush3.msra.mxu0 %v924_v28 }
 0x743   :  { %2305 = vmatprep.subr.mxu0 %v923_v39 }
 0x744   :  { %2306 = vmatpush3.msra.mxu0 %v923_v39 }
 0x745   :  { %2307 = vmatprep.subr.mxu0 %v922_v25 }
 0x746   :  { %2308 = vmatpush3.msra.mxu0 %v922_v25 }
 0x7ff   :  { %v2300_v63 = vpop.f32.mrf.mxu0 }
 0x800   :  { %v877_v4 = vadd.f32 %v2300_v63, %v2012_v62 }
 0x801   :  { %v871_v5 = vpop.f32.mrf.mxu0 }
 0x802   :  { %v872_v7 = vadd.f32 %v2012_v62, %v871_v5  ;;  %v881_v0 = vadd.f32 %v877_v4, %v693_v48 }
 0x804   :  { %v887_v8 = vsel %vm75_vm0, %v881_v0, 0.0  ;;  %v880_v10 = vadd.f32 %v872_v7, %v692_v46 }
 0x805   :  { %888 = vadd.xlane.f32.xlu0 %v887_v8 }
 0x806   :  { %v884_v13 = vsel %vm75_vm0, %v880_v10, 0.0 }
 0x807   :  { %885 = vadd.xlane.f32.xlu1 %v884_v13 }
 0x88e   :  { %v889_v16 = vpop.xlane.xlu0 %888 }
 0x88f   :  { %v891_v14 = vmul.f32 0.03125, %v889_v16 }
 0x890   :  { %v886_v18 = vpop.xlane.xlu1 %885 }
 0x891   :  { %v893_v12 = vsub.f32 %v881_v0, %v891_v14  ;;  %v890_v22 = vmul.f32 0.03125, %v886_v18 }
 0x893   :  { %v892_v27 = vsub.f32 %v880_v10, %v890_v22  ;;  %v895_v30 = vmul.f32 %v893_v12, %v893_v12 }
 0x895   :  { %v899_v32 = vsel %vm75_vm0, %v895_v30, 0.0  ;;  %v894_v34 = vmul.f32 %v892_v27, %v892_v27 }
 0x896   :  { %900 = vadd.xlane.f32.xlu0 %v899_v32 }
 0x897   :  { %v896_v35 = vsel %vm75_vm0, %v894_v34, 0.0 }
 0x898   :  { %897 = vadd.xlane.f32.xlu1 %v896_v35 }
 0x91f   :  { %v901_v40 = vpop.xlane.xlu0 %900 }
 0x920   :  { %v903_v41 = vmul.f32 0.03125, %v901_v40 }
 0x921   :  { %v898_v42 = vpop.xlane.xlu1 %897 }
 0x922   :  { %v905_v43 = vadd.f32 1e-05, %v903_v41  ;;  %v902_v44 = vmul.f32 0.03125, %v898_v42 }
 0x924   :  { %2485 = vrsqrt.f32 %v905_v43  ;;  %v904_v45 = vadd.f32 1e-05, %v902_v44  ;;  %v1362_v43 = vld [vmem:[#allocation5 + $0x1c8] sm:$0xff]  ;;  %v1361_v44 = vld [vmem:[#allocation5 + $0x1c0] sm:$0xff] }
 0x926   :  { %2487 = vrsqrt.f32 %v904_v45 }
 0x931   :  { %v2486_v46 = vpop.eup %2485 }
 0x932   :  { %v909_v48 = vmul.f32 %v2486_v46, %v893_v12 }
 0x933   :  { %v2488_v50 = vpop.eup %2487 }
 0x934   :  { %v908_v52 = vmul.f32 %v2488_v50, %v892_v27  ;;  %v915_v53 = vmul.f32 %v2015_v47, %v909_v48 }
 0x936   :  { %v914_v55 = vmul.f32 %v2015_v47, %v908_v52  ;;  %v2832_v57 = vadd.f32 %v2016_v54, %v915_v53  ;;  %v1360_v53 = vld [vmem:[#allocation5 + $0x1b8] sm:$0xff] }
 0x938   :  { %v2830_v56 = vadd.f32 %v2016_v54, %v914_v55  ;;  %v1359_v54 = vld [vmem:[#allocation5 + $0x1b0] sm:$0xff] }
 0x93a   :  { %2309 = vmatprep.mubr.msk.f32.mxu0 %vm75_vm0, %v2830_v56 }
 0x93b   :  { %2310 = vmatmul.mubr.msk.f32.vlgmr.msra.gmra.mxu0 %vm75_vm0, %v2832_v57 }
 0x9fb   :  { %v2311_v59 = vpop.f32.mrf.mxu0 }
 0x9fc   :  { %v2838_v60 = vadd.f32 %v2311_v59, %v2017_v58  ;;  %v2034_v59 = vld [vmem:[#allocation5 + $0x1d0] ss:$0 sm:$0xff] }
 0x9fd   :  { %v1003_v1 = vpop.f32.mrf.mxu0 }
 0x9fe   :  { %v1004_v2 = vadd.f32 %v2017_v58, %v1003_v1  ;;  %v1019_v61 = vmul.f32 %v2838_v60, %v2634_v20  ;;  %v1017_v62 = vmul.f32 %v2838_v60, %v2636_v21  ;;  %v1015_v63 = vmul.f32 %v2838_v60, %v2653_v31 }
 0x9ff   :  { %v1013_v4 = vmul.f32 %v2838_v60, %v2666_v36 }
 0xa00   :  { %1050 = vrot.lane.b32.xlu1 %v1019_v61, %s2576_s1  ;;  %2328 = vmatprep.mubr.msk.f32.mxu0 %vm75_vm0, %v1004_v2  ;;  %v1018_v3 = vmul.f32 %v1004_v2, %v2638_v23  ;;  %v1016_v20 = vmul.f32 %v1004_v2, %v2642_v26  ;;  %v1014_v23 = vmul.f32 %v1004_v2, %v2658_v33 }
 0xa01   :  { %v1012_v21 = vmul.f32 %v1004_v2, %v2671_v38  ;;  %v1026_v12 = vmul.f32 %v1004_v2, %v2754_v6  ;;  %v1024_v22 = vmul.f32 %v1004_v2, %v2763_v11  ;;  %v1022_v27 = vmul.f32 %v1004_v2, %v2773_v17 }
 0xa02   :  { %1048 = vrot.lane.b32.xlu0 %v1018_v3, %s2576_s1  ;;  %v1020_v6 = vmul.f32 %v1004_v2, %v2783_v24  ;;  %v1023_v11 = vmul.f32 %v2838_v60, %v2778_v19 }
 0xa04   :  { %1046 = vrot.lane.b32.xlu1 %v1017_v62, %s2576_s1 }
 0xa06   :  { %1042 = vrot.lane.b32.xlu0 %v1015_v63, %s2576_s1 }
 0xa08   :  { %1044 = vrot.lane.b32.xlu1 %v1016_v20, %s2576_s1 }
 0xa0a   :  { %1038 = vrot.lane.b32.xlu0 %v1013_v4, %s2576_s1 }
 0xa0c   :  { %1040 = vrot.lane.b32.xlu1 %v1014_v23, %s2576_s1 }
 0xa10   :  { %1036 = vrot.lane.b32.xlu1 %v1012_v21, %s2576_s1 }
 0xa72   :  { %v1051_v31 = vpop.permute.xlu1 %1050 }
 0xa73   :  { %2312 = vmatprep.subr.msk.mxu0 %vm75_vm0, %v1051_v31 }
 0xa74   :  { %2313 = vmatpush3.xpose.msk.msra.mxu0 %vm75_vm0, %v1051_v31  ;;  %v1049_v26 = vpop.permute.xlu0 %1048 }
 0xa75   :  { %2314 = vmatprep.subr.msk.mxu0 %vm75_vm0, %v1049_v26 }
 0xa76   :  { %v1047_v5 = vpop.permute.xlu1 %1046 }
 0xa78   :  { %2315 = vmatpush3.xpose.msk.msra.mxu0 %vm75_vm0, %v1049_v26  ;;  %v1043_v36 = vpop.permute.xlu0 %1042 }
 0xa79   :  { %2316 = vmatprep.subr.msk.mxu0 %vm75_vm0, %v1047_v5 }
 0xa7a   :  { %v1045_v33 = vpop.permute.xlu1 %1044 }
 0xa7c   :  { %2317 = vmatpush3.xpose.msk.msra.mxu0 %vm75_vm0, %v1047_v5  ;;  %v1039_v7 = vpop.permute.xlu0 %1038 }
 0xa7d   :  { %2318 = vmatprep.subr.msk.mxu0 %vm75_vm0, %v1045_v33 }
 0xa7e   :  { %v1041_v38 = vpop.permute.xlu1 %1040 }
 0xa80   :  { %2319 = vmatpush3.xpose.msk.msra.mxu0 %vm75_vm0, %v1045_v33 }
 0xa81   :  { %2320 = vmatprep.subr.msk.mxu0 %vm75_vm0, %v1043_v36 }
 0xa82   :  { %v1037_v0 = vpop.permute.xlu1 %1036 }
 0xa84   :  { %2321 = vmatpush3.xpose.msk.msra.mxu0 %vm75_vm0, %v1043_v36 }
 0xa85   :  { %2322 = vmatprep.subr.msk.mxu0 %vm75_vm0, %v1041_v38 }
 0xa88   :  { %2323 = vmatpush3.xpose.msk.msra.mxu0 %vm75_vm0, %v1041_v38 }
 0xa89   :  { %2324 = vmatprep.subr.msk.mxu0 %vm75_vm0, %v1039_v7 }
 0xa8c   :  { %2325 = vmatpush3.xpose.msk.msra.mxu0 %vm75_vm0, %v1039_v7  ;;  %v1494_v7 = vld [vmem:[#allocation5 + $0x200] sm:$0xff] }
 0xa8d   :  { %2326 = vmatprep.subr.msk.mxu0 %vm75_vm0, %v1037_v0 }
 0xa90   :  { %2327 = vmatpush3.xpose.msk.msra.mxu0 %vm75_vm0, %v1037_v0  ;;  %v1492_v0 = vld [vmem:[#allocation5 + $0x1f0] sm:$0xff] }
 0xa91   :  { %2369 = vmatprep.subr.mxu0 %v1362_v43 }
 0xa93   :  { %2329 = vmatmul.mubr.msk.f32.vlgmr.msra.gmra.mxu0 %vm75_vm0, %v2838_v60 }
 0xa94   :  { %2370 = vmatpush3.msra.mxu0 %v1362_v43 }
 0xa95   :  { %2371 = vmatprep.subr.mxu0 %v1361_v44 }
 0xa96   :  { %2372 = vmatpush3.msra.mxu0 %v1361_v44 }
 0xa97   :  { %2373 = vmatprep.subr.mxu0 %v1360_v53 }
 0xa98   :  { %2374 = vmatpush3.msra.mxu0 %v1360_v53 }
 0xa99   :  { %2375 = vmatprep.subr.mxu0 %v1359_v54 }
 0xa9a   :  { %2376 = vmatpush3.msra.mxu0 %v1359_v54 }
 0xb53   :  { %v2330_v8 = vpop.f32.mrf.mxu0 }
 0xb54   :  { %v1146_v10 = vadd.f32 %v2330_v8, %v2698_v49  ;;  %v1027_v49 = vmul.f32 %v2838_v60, %v2758_v9  ;;  %v1021_v9 = vmul.f32 %v2838_v60, %v2788_v29  ;;  %v1491_v8 = vld [vmem:[#allocation5 + $0x1e8] sm:$0xff] }
 0xb55   :  { %v1140_v13 = vpop.f32.mrf.mxu0 }
 0xb56   :  { %v1141_v16 = vadd.f32 %v1140_v13, %v2700_v51  ;;  %v1152_v14 = vsel %vm350_vm1, %v1146_v10, -inf  ;;  %v1025_v51 = vmul.f32 %v2838_v60, %v2768_v15  ;;  %v1589_v13 = vld [vmem:[#allocation5 + $0x240] sm:$0xff] }
 0xb57   :  { %1153 = vmax.xlane.f32.xlu1 %v1152_v14  ;;  %v1587_v14 = vld [vmem:[#allocation5 + $0x230] sm:$0xff] }
 0xb58   :  { %v1149_v18 = vsel %vm350_vm1, %v1141_v16, -inf }
 0xb59   :  { %1150 = vmax.xlane.f32.xlu0 %v1149_v18 }
 0xb68   :  { %1266 = vrot.lane.b32.xlu1 %v1026_v12, %s2577_s21 }
 0xb6c   :  { %1262 = vrot.lane.b32.xlu1 %v1024_v22, %s2577_s21 }
 0xb6f   :  { %1268 = vrot.lane.b32.xlu0 %v1027_v49, %s2577_s21 }
 0xb70   :  { %1258 = vrot.lane.b32.xlu1 %v1022_v27, %s2577_s21 }
 0xb73   :  { %1264 = vrot.lane.b32.xlu0 %v1025_v51, %s2577_s21 }
 0xb74   :  { %1254 = vrot.lane.b32.xlu1 %v1020_v6, %s2577_s21 }
 0xb77   :  { %1260 = vrot.lane.b32.xlu0 %v1023_v11, %s2577_s21  ;;  %v2037_v11 = vld [vmem:[#allocation5 + $0x1d8] ss:$0 sm:$0xff] }
 0xb7b   :  { %1256 = vrot.lane.b32.xlu0 %v1021_v9, %s2577_s21 }
 0xbe0   :  { %v1154_v17 = vpop.xlane.xlu1 %1153 }
 0xbe1   :  { %v1156_v30 = vsub.f32 %v1146_v10, %v1154_v17  ;;  %v1590_v10 = vld [vmem:[#allocation5 + $0x248] sm:$0xff]  ;;  %v2038_v17 = vld [vmem:[#allocation5 + $0x1e0] ss:$0 sm:$0xff] }
 0xbe2   :  { %v1151_v32 = vpop.xlane.xlu0 %1150  ;;  %2391 = vmatprep.subr.mxu0 %v1590_v10 }
 0xbe3   :  { %v1155_v15 = vsub.f32 %v1141_v16, %v1151_v32  ;;  %v1159_v34 = vmul.f32 1.442695, %v1156_v30  ;;  %v1588_v16 = vld [vmem:[#allocation5 + $0x238] sm:$0xff] }
 0xbe4   :  { %v1267_v37 = vpop.permute.xlu1 %1266 }
 0xbe5   :  { %v1157_v24 = vmul.f32 1.442695, %v1155_v15 }
 0xbe6   :  { %v1269_v35 = vpop.permute.xlu0 %1268 }
 0xbe7   :  { %2489 = vpow2.f32 %v1157_v24  ;;  %2350 = vmatprep.subr.mxu1 %v1269_v35 }
 0xbe8   :  { %2491 = vpow2.f32 %v1159_v34  ;;  %v1263_v29 = vpop.permute.xlu1 %1262 }
 0xbea   :  { %v1265_v39 = vpop.permute.xlu0 %1264 }
 0xbec   :  { %v1259_v40 = vpop.permute.xlu1 %1258 }
 0xbee   :  { %v1261_v25 = vpop.permute.xlu0 %1260 }
 0xbf0   :  { %v1255_v42 = vpop.permute.xlu1 %1254 }
 0xbf2   :  { %v1257_v41 = vpop.permute.xlu0 %1256 }
 0xbf4   :  { %v2490_v28 = vpop.eup %2489 }
 0xbf5   :  { %v2492_v19 = vpop.eup %2491  ;;  %2347 = vmatprep.mubr.msk.f32.mxu1 %vm350_vm1, %v2490_v28 }
 0xbf6   :  { %2348 = vmatmul.mubr.msk.f32.vlgmr.msra.gmra.mxu1 %vm350_vm1, %v2492_v19 }
 0xbf7   :  { %2351 = vmatpush3.msra.mxu1 %v1269_v35 }
 0xbf8   :  { %2352 = vmatprep.subr.mxu1 %v1267_v37 }
 0xbf9   :  { %2353 = vmatpush3.msra.mxu1 %v1267_v37  ;;  %v1586_v37 = vld [vmem:[#allocation5 + $0x228] sm:$0xff] }
 0xbfa   :  { %2354 = vmatprep.subr.mxu1 %v1265_v39 }
 0xbfb   :  { %2355 = vmatpush3.msra.mxu1 %v1265_v39  ;;  %v1583_v39 = vld [vmem:[#allocation5 + $0x210] sm:$0xff] }
 0xbfc   :  { %2356 = vmatprep.subr.mxu1 %v1263_v29 }
 0xbfd   :  { %2357 = vmatpush3.msra.mxu1 %v1263_v29  ;;  %v2039_v29 = vld [vmem:[#allocation5 + $0x208] ss:$0 sm:$0xff] }
 0xbfe   :  { %2358 = vmatprep.subr.mxu1 %v1261_v25 }
 0xbff   :  { %2359 = vmatpush3.msra.mxu1 %v1261_v25 }
 0xc00   :  { %2360 = vmatprep.subr.mxu1 %v1259_v40 }
 0xc01   :  { %2361 = vmatpush3.msra.mxu1 %v1259_v40 }
 0xc02   :  { %2362 = vmatprep.subr.mxu1 %v1257_v41 }
 0xc03   :  { %2363 = vmatpush3.msra.mxu1 %v1257_v41 }
 0xc04   :  { %2364 = vmatprep.subr.mxu1 %v1255_v42 }
 0xc05   :  { %2365 = vmatpush3.msra.mxu1 %v1255_v42 }
 0xc06   :  { %2380 = vmatprep.subr.mxu1 %v1494_v7 }
 0xcb6   :  { %v2349_v45 = vpop.f32.mrf.mxu1 }
 0xcb7   :  { %2493 = vrcp.f32 %v2349_v45  ;;  %v2042_v45 = vld [vmem:[#allocation5 + $0x250] ss:$0 sm:$0xff] }
 0xcb8   :  { %v1233_v46 = vpop.f32.mrf.mxu1 }
 0xcb9   :  { %2495 = vrcp.f32 %v1233_v46 }
 0xcc4   :  { %v2494_v47 = vpop.eup %2493 }
 0xcc5   :  { %v1245_v52 = vmul.f32 %v2494_v47, %v2492_v19  ;;  %v1584_v19 = vld [vmem:[#allocation5 + $0x218] sm:$0xff] }
 0xcc6   :  { %v2496_v48 = vpop.eup %2495 }
 0xcc7   :  { %v1244_v50 = vmul.f32 %v2496_v48, %v2490_v28  ;;  %v1585_v28 = vld [vmem:[#allocation5 + $0x220] sm:$0xff] }
 0xcc9   :  { %2366 = vmatprep.mubr.msk.f32.mxu1 %vm350_vm1, %v1244_v50 }
 0xcca   :  { %2367 = vmatmul.mubr.msk.f32.vlgmr.msra.gmra.mxu1 %vm350_vm1, %v1245_v52 }
 0xccb   :  { %2381 = vmatpush3.msra.mxu1 %v1494_v7 }
 0xd8a   :  { %v2368_v55 = vpop.f32.mrf.mxu1 }
 0xd8c   :  { %v1350_v58 = vpop.f32.mrf.mxu1 }
 0xd8d   :  { %2377 = vmatprep.mubr.msk.f32.mxu0 %vm75_vm0, %v1350_v58 }
 0xd8e   :  { %2378 = vmatmul.mubr.msk.f32.vlgmr.msra.gmra.mxu0 %vm75_vm0, %v2368_v55 }
 0xd8f   :  { %2392 = vmatpush3.msra.mxu0 %v1590_v10 }
 0xd90   :  { %2393 = vmatprep.subr.mxu0 %v1589_v13 }
 0xd91   :  { %2394 = vmatpush3.msra.mxu0 %v1589_v13 }
 0xd92   :  { %2395 = vmatprep.subr.mxu0 %v1588_v16 }
 0xd93   :  { %2396 = vmatpush3.msra.mxu0 %v1588_v16 }
 0xd94   :  { %2397 = vmatprep.subr.mxu0 %v1587_v14 }
 0xd95   :  { %2398 = vmatpush3.msra.mxu0 %v1587_v14  ;;  %v1719_v14 = vld [vmem:[#allocation5 + $0xa0] sm:$0x3] }
 0xd96   :  { %2399 = vmatprep.subr.mxu0 %v1586_v37 }
 0xd97   :  { %2400 = vmatpush3.msra.mxu0 %v1586_v37  ;;  %v1884_v37 = vld [vmem:[#allocation5 + $0x2c0] sm:$0xff] }
 0xd98   :  { %2401 = vmatprep.subr.mxu0 %v1585_v28 }
 0xd99   :  { %2402 = vmatpush3.msra.mxu0 %v1585_v28  ;;  %v1883_v28 = vld [vmem:[#allocation5 + $0x2b8] sm:$0xff] }
 0xd9a   :  { %2403 = vmatprep.subr.mxu0 %v1584_v19 }
 0xd9b   :  { %2404 = vmatpush3.msra.mxu0 %v1584_v19  ;;  %v1882_v19 = vld [vmem:[#allocation5 + $0x2b0] sm:$0xff] }
 0xd9c   :  { %2405 = vmatprep.subr.mxu0 %v1583_v39 }
 0xd9d   :  { %2406 = vmatpush3.msra.mxu0 %v1583_v39  ;;  %v1881_v39 = vld [vmem:[#allocation5 + $0x2a8] sm:$0xff] }
 0xe4e   :  { %v2379_v60 = vpop.f32.mrf.mxu0 }
 0xe4f   :  { %v1446_v1 = vadd.f32 %v2379_v60, %v2034_v59 }
 0xe50   :  { %v1440_v2 = vpop.f32.mrf.mxu0 }
 0xe51   :  { %v1441_v61 = vadd.f32 %v2034_v59, %v1440_v2  ;;  %v1450_v3 = vadd.f32 %v1446_v1, %v2832_v57 }
 0xe53   :  { %v1456_v62 = vsel %vm75_vm0, %v1450_v3, 0.0  ;;  %v1449_v63 = vadd.f32 %v1441_v61, %v2830_v56  ;;  %v1493_v56 = vld [vmem:[#allocation5 + $0x1f8] sm:$0xff] }
 0xe54   :  { %1457 = vadd.xlane.f32.xlu1 %v1456_v62  ;;  %2382 = vmatprep.subr.mxu1 %v1493_v56 }
 0xe55   :  { %v1453_v20 = vsel %vm75_vm0, %v1449_v63, 0.0  ;;  %2383 = vmatpush3.msra.mxu1 %v1493_v56  ;;  %v2046_v56 = vld [vmem:[#allocation5 + $0x260] ss:$0 sm:$0xff] }
 0xe56   :  { %1454 = vadd.xlane.f32.xlu0 %v1453_v20  ;;  %2384 = vmatprep.subr.mxu1 %v1492_v0 }
 0xe57   :  { %2385 = vmatpush3.msra.mxu1 %v1492_v0 }
 0xe58   :  { %2386 = vmatprep.subr.mxu1 %v1491_v8 }
 0xe59   :  { %2387 = vmatpush3.msra.mxu1 %v1491_v8 }
 0xedd   :  { %v1458_v4 = vpop.xlane.xlu1 %1457 }
 0xede   :  { %v1460_v23 = vmul.f32 0.03125, %v1458_v4  ;;  %v2578_v4 = vmov 0.0  }
 0xedf   :  { %v1455_v21 = vpop.xlane.xlu0 %1454  ;;  %2410 = vmatprep.subr.mxu1 %v2578_v4 }
 0xee0   :  { %v1459_v31 = vmul.f32 0.03125, %v1455_v21  ;;  %v1462_v26 = vsub.f32 %v1450_v3, %v1460_v23 }
 0xee2   :  { %v1461_v5 = vsub.f32 %v1449_v63, %v1459_v31  ;;  %v1464_v38 = vmul.f32 %v1462_v26, %v1462_v26 }
 0xee4   :  { %v1463_v33 = vmul.f32 %v1461_v5, %v1461_v5  ;;  %v1468_v57 = vsel %vm75_vm0, %v1464_v38, 0.0  ;;  %v2045_v38 = vld [vmem:[#allocation5 + $0x258] ss:$0 sm:$0xff] }
 0xee6   :  { %v1465_v36 = vsel %vm75_vm0, %v1463_v33, 0.0 }
 0xee7   :  { %1466 = vadd.xlane.f32.xlu0 %v1465_v36 }
 0xeeb   :  { %1469 = vadd.xlane.f32.xlu0 %v1468_v57 }
 0xf70   :  { %v1467_v18 = vpop.xlane.xlu0 %1466 }
 0xf71   :  { %v1471_v12 = vmul.f32 0.03125, %v1467_v18  ;;  %v1798_v18 = vld [vmem:[#allocation5 + $0x280] sm:$0xff] }
 0xf73   :  { %v1473_v22 = vadd.f32 1e-05, %v1471_v12  ;;  %v1797_v12 = vld [vmem:[#allocation5 + $0x278] sm:$0xff] }
 0xf74   :  { %v1470_v49 = vpop.xlane.xlu0 %1469 }
 0xf75   :  { %2497 = vrsqrt.f32 %v1473_v22  ;;  %v1472_v27 = vmul.f32 0.03125, %v1470_v49  ;;  %v1796_v22 = vld [vmem:[#allocation5 + $0x270] sm:$0xff]  ;;  %v1795_v49 = vld [vmem:[#allocation5 + $0x268] sm:$0xff] }
 0xf77   :  { %v1474_v51 = vadd.f32 1e-05, %v1472_v27 }
 0xf79   :  { %2499 = vrsqrt.f32 %v1474_v51 }
 0xf82   :  { %v2498_v6 = vpop.eup %2497 }
 0xf83   :  { %v1477_v9 = vmul.f32 %v2498_v6, %v1461_v5  ;;  %v1893_v6 = vld [vmem:[#allocation5 + $0x308] sm:$0xff] }
 0xf85   :  { %v1483_v30 = vmul.f32 %v2037_v11, %v1477_v9  ;;  %v1892_v9 = vld [vmem:[#allocation5 + $0x300] sm:$0xff] }
 0xf86   :  { %v2500_v32 = vpop.eup %2499 }
 0xf87   :  { %v1478_v15 = vmul.f32 %v2500_v32, %v1462_v26  ;;  %v1489_v34 = vadd.f32 %v2038_v17, %v1483_v30  ;;  %v1890_v30 = vld [vmem:[#allocation5 + $0x2f0] sm:$0xff]  ;;  %v1889_v32 = vld [vmem:[#allocation5 + $0x2e8] sm:$0xff] }
 0xf89   :  { %v1484_v24 = vmul.f32 %v2037_v11, %v1478_v15  ;;  %2388 = vmatprep.mubr.msk.f32.mxu1 %vm75_vm0, %v1489_v34  ;;  %v1888_v15 = vld [vmem:[#allocation5 + $0x2e0] sm:$0xff] }
 0xf8b   :  { %v1490_v35 = vadd.f32 %v2038_v17, %v1484_v24  ;;  %v1891_v17 = vld [vmem:[#allocation5 + $0x2f8] sm:$0xff]  ;;  %v1886_v24 = vld [vmem:[#allocation5 + $0x2d0] sm:$0xff] }
 0xf8d   :  { %2389 = vmatmul.mubr.msk.f32.vlgmr.msra.gmra.mxu1 %vm75_vm0, %v1490_v35 }
 0xf8e   :  { %2414 = vmatprep.mubr.msk.f32.mxu1 %vm2579_vm2, %v2578_v4 }
0x104d   :  { %v2390_v25 = vpop.f32.mrf.mxu1 }
0x104e   :  { %v1578_v40 = vadd.f32 %v2390_v25, %v2039_v29  ;;  %v1879_v25 = vld [vmem:[#allocation5 + $0x298] sm:$0xff] }
0x104f   :  { %v1572_v41 = vpop.f32.mrf.mxu1 }
0x1050   :  { %v1573_v42 = vadd.f32 %v2039_v29, %v1572_v41  ;;  %v1582_v44 = vmax.f32 %v1578_v40, 0.0  ;;  %v1880_v29 = vld [vmem:[#allocation5 + $0x2a0] sm:$0xff]  ;;  %v1878_v40 = vld [vmem:[#allocation5 + $0x290] sm:$0xff]  ;;  %v2048_v41 = vld [vmem:[#allocation5 + $0x288] ss:$0 sm:$0xff] }
0x1052   :  { %v1581_v43 = vmax.f32 %v1573_v42, 0.0 }
0x1054   :  { %2407 = vmatprep.mubr.msk.f32.mxu0 %vm350_vm1, %v1581_v43 }
0x1055   :  { %2408 = vmatmul.mubr.msk.f32.vlgmr.msra.gmra.mxu0 %vm350_vm1, %v1582_v44 }
0x1115   :  { %v2409_v46 = vpop.f32.mrf.mxu0 }
0x1116   :  { %v1674_v47 = vadd.f32 %v2409_v46, %v2042_v45  ;;  %v2050_v46 = vld [vmem:[#allocation5 + $0x310] ss:$0 sm:$0xff] }
0x1117   :  { %v1668_v48 = vpop.f32.mrf.mxu0 }
0x1118   :  { %v1669_v50 = vadd.f32 %v2042_v45, %v1668_v48  ;;  %v1678_v52 = vadd.f32 %v1674_v47, %v1490_v35  ;;  %v1885_v35 = vld [vmem:[#allocation5 + $0x2c8] sm:$0xff] }
0x111a   :  { %v1684_v53 = vsel %vm75_vm0, %v1678_v52, 0.0  ;;  %v1677_v54 = vadd.f32 %v1669_v50, %v1489_v34  ;;  %v1887_v34 = vld [vmem:[#allocation5 + $0x2d8] sm:$0xff] }
0x111b   :  { %1685 = vadd.xlane.f32.xlu1 %v1684_v53 }
0x111c   :  { %v1681_v55 = vsel %vm75_vm0, %v1677_v54, 0.0 }
0x111d   :  { %1682 = vadd.xlane.f32.xlu0 %v1681_v55 }
0x11a4   :  { %v1686_v58 = vpop.xlane.xlu1 %1685 }
0x11a5   :  { %v1688_v59 = vmul.f32 0.03125, %v1686_v58 }
0x11a6   :  { %v1683_v60 = vpop.xlane.xlu0 %1682 }
0x11a7   :  { %v1690_v1 = vsub.f32 %v1678_v52, %v1688_v59  ;;  %v1687_v2 = vmul.f32 0.03125, %v1683_v60 }
0x11a9   :  { %v1689_v61 = vsub.f32 %v1677_v54, %v1687_v2  ;;  %v1692_v3 = vmul.f32 %v1690_v1, %v1690_v1 }
0x11ab   :  { %v1696_v62 = vsel %vm75_vm0, %v1692_v3, 0.0  ;;  %v1691_v63 = vmul.f32 %v1689_v61, %v1689_v61 }
0x11ac   :  { %1697 = vadd.xlane.f32.xlu1 %v1696_v62 }
0x11ad   :  { %v1693_v20 = vsel %vm75_vm0, %v1691_v63, 0.0 }
0x11ae   :  { %1694 = vadd.xlane.f32.xlu0 %v1693_v20 }
0x1235   :  { %v1698_v23 = vpop.xlane.xlu1 %1697 }
0x1236   :  { %v1700_v21 = vmul.f32 0.03125, %v1698_v23 }
0x1237   :  { %v1695_v31 = vpop.xlane.xlu0 %1694 }
0x1238   :  { %v1702_v26 = vadd.f32 1e-05, %v1700_v21  ;;  %v1699_v5 = vmul.f32 0.03125, %v1695_v31 }
0x123a   :  { %2501 = vrsqrt.f32 %v1702_v26  ;;  %v1701_v33 = vadd.f32 1e-05, %v1699_v5 }
0x123c   :  { %2503 = vrsqrt.f32 %v1701_v33 }
0x1247   :  { %v2502_v36 = vpop.eup %2501 }
0x1248   :  { %v1706_v57 = vmul.f32 %v2502_v36, %v1690_v1 }
0x1249   :  { %v2504_v7 = vpop.eup %2503 }
0x124a   :  { %v1712_v0 = vmul.f32 %v2045_v38, %v1706_v57  ;;  %v1705_v8 = vmul.f32 %v2504_v7, %v1689_v61 }
0x124c   :  { %v1718_v10 = vadd.f32 %v2046_v56, %v1712_v0  ;;  %v1711_v13 = vmul.f32 %v2045_v38, %v1705_v8 }
0x124e   :  { %2411 = vmatpush3.msra.mxu1 %v1718_v10  ;;  %v1717_v16 = vadd.f32 %v2046_v56, %v1711_v13 }
0x124f   :  { %2412 = vmatprep.subr.mxu1 %v2578_v4 }
0x1250   :  { %2413 = vmatpush3.msra.mxu1 %v1717_v16 }
0x1251   :  { %2415 = vmatmul.mubr.msk.f32.vlgmr.msra.gmra.mxu1 %vm1720_vm3, %v1719_v14  ;;  %2417 = vmatprep.subr.mxu1 %v2578_v4 }
0x1252   :  { %2418 = vmatpush3.msra.mxu1 %v1798_v18  ;;  %2425 = vmatprep.mubr.msk.f32.mxu1 %vm2579_vm2, %v2578_v4 }
0x1253   :  { %2419 = vmatprep.subr.mxu1 %v2578_v4 }
0x1254   :  { %2420 = vmatpush3.msra.mxu1 %v1797_v12 }
0x1255   :  { %2421 = vmatprep.subr.mxu1 %v2578_v4 }
0x1256   :  { %2422 = vmatpush3.msra.mxu1 %v1796_v22 }
0x1257   :  { %2423 = vmatprep.subr.mxu1 %v2578_v4 }
0x1258   :  { %2424 = vmatpush3.msra.mxu1 %v1795_v49 }
0x1259   :  { %2428 = vmatprep.subr.mxu1 %v2578_v4 }
0x1311   :  { %v1790_v27 = vpop.f32.mrf.mxu1 }
0x1312   :  { %v1794_v51 = vmax.f32 %v1790_v27, 0.0 }
0x1313   :  { %v2416_v11 = vpop.f32.mrf.mxu1 }
0x1314   :  { %2426 = vmatmul.mubr.msk.f32.vlgmr.msra.gmra.mxu1 %vm75_vm0, %v1794_v51 }
0x1315   :  { %2429 = vmatpush3.msra.mxu1 %v1893_v6  ;;  %2460 = vmatprep.mubr.msk.f32.mxu1 %vm2579_vm2, %v2578_v4 }
0x1316   :  { %2430 = vmatprep.subr.mxu1 %v2578_v4 }
0x1317   :  { %2431 = vmatpush3.msra.mxu1 %v1892_v9 }
0x1318   :  { %2432 = vmatprep.subr.mxu1 %v2578_v4 }
0x1319   :  { %2433 = vmatpush3.msra.mxu1 %v1891_v17 }
0x131a   :  { %2434 = vmatprep.subr.mxu1 %v2578_v4 }
0x131b   :  { %2435 = vmatpush3.msra.mxu1 %v1890_v30 }
0x131c   :  { %2436 = vmatprep.subr.mxu1 %v2578_v4 }
0x131d   :  { %2437 = vmatpush3.msra.mxu1 %v1889_v32 }
0x131e   :  { %2438 = vmatprep.subr.mxu1 %v2578_v4 }
0x131f   :  { %2439 = vmatpush3.msra.mxu1 %v1888_v15 }
0x1320   :  { %2440 = vmatprep.subr.mxu1 %v2578_v4 }
0x1321   :  { %2441 = vmatpush3.msra.mxu1 %v1887_v34 }
0x1322   :  { %2442 = vmatprep.subr.mxu1 %v2578_v4 }
0x1323   :  { %2443 = vmatpush3.msra.mxu1 %v1886_v24 }
0x1324   :  { %2444 = vmatprep.subr.mxu1 %v2578_v4 }
0x1325   :  { %2445 = vmatpush3.msra.mxu1 %v1885_v35 }
0x1326   :  { %2446 = vmatprep.subr.mxu1 %v2578_v4 }
0x1327   :  { %2447 = vmatpush3.msra.mxu1 %v1884_v37 }
0x1328   :  { %2448 = vmatprep.subr.mxu1 %v2578_v4 }
0x1329   :  { %2449 = vmatpush3.msra.mxu1 %v1883_v28 }
0x132a   :  { %2450 = vmatprep.subr.mxu1 %v2578_v4 }
0x132b   :  { %2451 = vmatpush3.msra.mxu1 %v1882_v19 }
0x132c   :  { %2452 = vmatprep.subr.mxu1 %v2578_v4 }
0x132d   :  { %2453 = vmatpush3.msra.mxu1 %v1881_v39 }
0x132e   :  { %2454 = vmatprep.subr.mxu1 %v2578_v4 }
0x132f   :  { %2455 = vmatpush3.msra.mxu1 %v1880_v29 }
0x1330   :  { %2456 = vmatprep.subr.mxu1 %v2578_v4 }
0x1331   :  { %2457 = vmatpush3.msra.mxu1 %v1879_v25 }
0x1332   :  { %2458 = vmatprep.subr.mxu1 %v2578_v4 }
0x1333   :  { %2459 = vmatpush3.msra.mxu1 %v1878_v40 }
0x13d4   :  { %v1873_v42 = vpop.f32.mrf.mxu1 }
0x13d5   :  { %v1874_v43 = vadd.f32 %v2048_v41, %v1873_v42 }
0x13d6   :  { %v2427_v44 = vpop.f32.mrf.mxu1 }
0x13d7   :  { %v1877_v45 = vmax.f32 %v1874_v43, 0.0 }
0x13d9   :  { %2461 = vmatmul.mubr.f32.vlgmr.msra.gmra.mxu1 %v1877_v45 }
0x1499   :  { %v1965_v47 = vpop.f32.mrf.mxu1 }
0x149a   :  { %v1966_v48 = vadd.f32 %v2050_v46, %v1965_v47 }
0x149b   :  { %v2462_v50 = vpop.f32.mrf.mxu1 }
0x149c   :  { %1970 = vst.msk [vmem:[#allocation7] sm:$0x3] %vm1969_vm4, %v1966_v48 }
0x149d   :  { %2556 = shalt.err (!%p2553_p0)
}
0x149e   :  { %1980 = dma.vmem_to_hbm [thread:$0]  %s1978_s23, 32, %s2957_s2, [#allocation4]  }
0x149f   :  { %2569 = dma.done.wait [#allocation4], 32  }
0x14a0   :  { %2570 = vsyncadd [#allocation4], 4294967264 }
0x14a1   :  { %1984 = vsyncpa [#allocation3], 1 }
0x14a2   :  { %1985 = vsyncpa [#allocation6], 1 }
0x14a3   :  { %1986 = vsyncpa [#allocation4], 1 }

</bundles_post_ra>
